<compile_context>
chip_gen: v5e
topology: v5e:2x2
jax: 0.10.0
libtpu: 0.0.40
codegen_flags: <defaults>
</compile_context>

<pallas_src>
import jax
import jax.numpy as jnp
from jax.experimental import pallas as pl
from jax.experimental.pallas import tpu as pltpu

F32 = jnp.float32


def _gated_gcn_net_kernel(
    # graph / input features
    h0_ref, e0_ref, G_ref, DmT_ref,
    # embedding weights
    wh_ref, bh_ref, we_ref, be_ref,
    # stacked per-layer weights [L, ...]
    Wn_ref,   # [L, H, 4H]   columns ordered [B | D | E | A]
    bn_ref,   # [L, 1, 4H]
    Wc_ref,   # [L, H, H]
    bc_ref,   # [L, 1, H]
    bnp_ref,  # [L, 4, H]    rows: scale_h, shift_h, scale_e, shift_e
    # MLP readout (w2/b2 zero-padded to a lane-dense 128-wide output)
    w0_ref, b0_ref, w1_ref, b1_ref, w2_ref, b2_ref,
    # output (padded)
    out_ref,
):
    L, H = Wn_ref.shape[0], Wn_ref.shape[1]
    N = h0_ref.shape[0]

    # ---- input embeddings (prologue, no phase gate) ----
    h = jnp.dot(h0_ref[...], wh_ref[...], preferred_element_type=F32) + bh_ref[...]
    e = jnp.dot(e0_ref[...], we_ref[...], preferred_element_type=F32) + be_ref[...]

    G = G_ref[...]        # [E, 2N] = [S | Dm]  (0/1 incidence)
    DmT = DmT_ref[...]    # [N, E]  scatter-add to dst nodes
    zero_NH = jnp.zeros((N, H), F32)   # hoisted: zero block of the gather RHS

    # ---- GatedGCN layers: unrolled static loop, weights fully VMEM-resident ----
    for l in range(L):
        # fused node projections, columns [B | D | E | A] (lane-0 aligned slabs)
        proj = jnp.dot(h, Wn_ref[l], preferred_element_type=F32) + bn_ref[l]   # [N, 4H]
        Ce = jnp.dot(e, Wc_ref[l], preferred_element_type=F32) + bc_ref[l]     # [E, H]

        # fused gather: [S | Dm] @ [[Bh|Dh],[0|Eh]] -> [Bh_src | Dh_src + Eh_dst]
        rhs = jnp.concatenate(
            [proj[:, :2 * H],
             jnp.concatenate([zero_NH, proj[:, 2 * H:3 * H]], axis=1)],
            axis=0)                                                             # [2N, 2H]
        gath = jnp.dot(G, rhs, preferred_element_type=F32)                      # [E, 2H]

        e_new = Ce + gath[:, H:2 * H]          # Ce + Dh_src + Eh_dst
        sigma = jax.nn.sigmoid(e_new)

        # fused scatter-add of numerator & denominator to dst nodes
        num_den = jnp.concatenate([sigma * gath[:, :H], sigma], axis=1)         # [E, 2H]
        agg = jnp.dot(DmT, num_den, preferred_element_type=F32)                 # [N, 2H]

        # TODO(synk): zero-in-degree nodes get h = Ah (empty-sum convention) whereas
        # DGL's update_all leaves their previous h untouched.
        h_new = proj[:, 3 * H:] + agg[:, :H] / (agg[:, H:2 * H] + 1e-6)

        # eval BatchNorm folded to scale/shift, ReLU, residual
        bnp = bnp_ref[l]                                                         # [4, H]
        h_new = h_new * bnp[0:1, :] + bnp[1:2, :]
        e_new = e_new * bnp[2:3, :] + bnp[3:4, :]
        h = h + jnp.maximum(h_new, 0.0)
        e = e + jnp.maximum(e_new, 0.0)

    # ---- MLP readout (epilogue), lane-dense padded output ----
    y = jnp.maximum(jnp.dot(h, w0_ref[...], preferred_element_type=F32) + b0_ref[...], 0.0)
    y = jnp.maximum(jnp.dot(y, w1_ref[...], preferred_element_type=F32) + b1_ref[...], 0.0)
    out_ref[...] = jnp.dot(y, w2_ref[...], preferred_element_type=F32) + b2_ref[...]


def gated_gcn_net_forward(h0, e0, src, dst, n_nodes, params):
    """Full GatedGCNNet forward (eval mode) as one fused, grid-less pallas_call."""
    N = h0.shape[0]
    w2, b2 = params['mlp'][4], params['mlp'][5]
    n_classes = w2.shape[1]
    out_pad = ((n_classes + 127) // 128) * 128   # lane-dense output columns

    w2p = jnp.pad(w2, ((0, 0), (0, out_pad - n_classes)))
    b2p = jnp.pad(b2, ((0, 0), (0, out_pad - n_classes)))

    # Dense one-hot incidence (toy graph only; see TODO at top for real OGBN sizes).
    S = jax.nn.one_hot(src, n_nodes, dtype=F32)    # [E, N] gather src-node feats
    Dm = jax.nn.one_hot(dst, n_nodes, dtype=F32)   # [E, N] gather dst-node feats
    G = jnp.concatenate([S, Dm], axis=1)           # [E, 2N] fused gather operand
    DmT = jnp.transpose(Dm)                        # [N, E]  scatter-add to dst nodes

    args = (h0, e0, G, DmT,
            params['emb_h'][0], params['emb_h'][1],
            params['emb_e'][0], params['emb_e'][1],
            params['Wn'], params['bn'], params['Wc'], params['bc'], params['bnp'],
            params['mlp'][0], params['mlp'][1], params['mlp'][2], params['mlp'][3],
            w2p, b2p)

    vmem_spec = lambda: pl.BlockSpec(memory_space=pltpu.MemorySpace.VMEM)

    out_padded = pl.pallas_call(
        _gated_gcn_net_kernel,
        out_shape=jax.ShapeDtypeStruct((N, out_pad), F32),
        in_specs=[vmem_spec() for _ in args],
        out_specs=vmem_spec(),
        compiler_params=pltpu.CompilerParams(
            vmem_limit_bytes=32 * 1024 * 1024),    # explicit budget (v7x: 64 MiB phys)
    )(*args)
    return out_padded[:, :n_classes]


# ----------------------------------- main --------------------------------------
if __name__ == "__main__":
    N, E = 32, 64
    in_dim, in_dim_edge = 16, 8
    hidden = 32        # hidden_dim == out_dim so residual applies everywhere
    n_classes = 7
    n_layers = 3       # L

    keys = iter(jax.random.split(jax.random.PRNGKey(0), 64))

    def nxt():
        return next(keys)

    def mk_linear(din, dout, scale=0.1):
        kw, kb = jax.random.split(nxt())
        w = scale * jax.random.normal(kw, (din, dout), F32)
        b = scale * jax.random.normal(kb, (1, dout), F32)
        return w, b

    def mk_bn_scale_shift(d, eps=1e-5):
        k1, k2, k3, k4 = jax.random.split(nxt(), 4)
        gamma = 1.0 + 0.1 * jax.random.normal(k1, (1, d), F32)
        beta = 0.1 * jax.random.normal(k2, (1, d), F32)
        mean = 0.1 * jax.random.normal(k3, (1, d), F32)
        var = 1.0 + 0.1 * jax.random.uniform(k4, (1, d), F32)
        scale = gamma * jax.lax.rsqrt(var + eps)     # eval-mode BN folded
        shift = beta - mean * scale
        return scale, shift

    # graph / input features
    h_in = jax.random.normal(nxt(), (N, in_dim), F32)
    e_in = jax.random.normal(nxt(), (E, in_dim_edge), F32)
    src = jax.random.randint(nxt(), (E,), 0, N)
    dst = jax.random.randint(nxt(), (E,), 0, N)

    # embeddings (pos_enc=False, edge_feat=True)
    w_eh, b_eh = mk_linear(in_dim, hidden)
    w_ee, b_ee = mk_linear(in_dim_edge, hidden)

    # per-layer params, fused & stacked along L; node-proj columns ordered [B | D | E | A]
    Wn_l, bn_l, Wc_l, bc_l, bnp_l = [], [], [], [], []
    for _ in range(n_layers):
        wA, bA = mk_linear(hidden, hidden)
        wB, bB = mk_linear(hidden, hidden)
        wC, bC = mk_linear(hidden, hidden)
        wD, bD = mk_linear(hidden, hidden)
        wE, bE = mk_linear(hidden, hidden)
        sh, th = mk_bn_scale_shift(hidden)   # bn_node_h
        se, te = mk_bn_scale_shift(hidden)   # bn_node_e
        Wn_l.append(jnp.concatenate([wB, wD, wE, wA], axis=1))   # [H, 4H]
        bn_l.append(jnp.concatenate([bB, bD, bE, bA], axis=1))   # [1, 4H]
        Wc_l.append(wC)
        bc_l.append(bC)
        bnp_l.append(jnp.concatenate([sh, th, se, te], axis=0))  # [4, H]

    w0, b0 = mk_linear(hidden, hidden // 2)
    w1, b1 = mk_linear(hidden // 2, hidden // 4)
    w2, b2 = mk_linear(hidden // 4, n_classes)

    params = {
        'emb_h': (w_eh, b_eh),
        'emb_e': (w_ee, b_ee),
        'Wn': jnp.stack(Wn_l),     # [L, H, 4H]
        'bn': jnp.stack(bn_l),     # [L, 1, 4H]
        'Wc': jnp.stack(Wc_l),     # [L, H, H]
        'bc': jnp.stack(bc_l),     # [L, 1, H]
        'bnp': jnp.stack(bnp_l),   # [L, 4, H]
        'mlp': (w0, b0, w1, b1, w2, b2),
    }

    out = gated_gcn_net_forward(h_in, e_in, src, dst, N, params)
    out = jax.block_until_ready(out)
    assert out.shape == (N, n_classes) and out.dtype == F32
    print("KERNEL_OK")
</pallas_src>

<mosaic_0001>
module attributes {stable_mosaic.version = 11 : i64} {
  func.func @_gated_gcn_net_kernel(%arg0: memref<32x16xf32, #tpu.memory_space<vmem>>, %arg1: memref<64x8xf32, #tpu.memory_space<vmem>>, %arg2: memref<64x64xf32, #tpu.memory_space<vmem>>, %arg3: memref<32x64xf32, #tpu.memory_space<vmem>>, %arg4: memref<16x32xf32, #tpu.memory_space<vmem>>, %arg5: memref<1x32xf32, #tpu.memory_space<vmem>>, %arg6: memref<8x32xf32, #tpu.memory_space<vmem>>, %arg7: memref<1x32xf32, #tpu.memory_space<vmem>>, %arg8: memref<3x32x128xf32, #tpu.memory_space<vmem>>, %arg9: memref<3x1x128xf32, #tpu.memory_space<vmem>>, %arg10: memref<3x32x32xf32, #tpu.memory_space<vmem>>, %arg11: memref<3x1x32xf32, #tpu.memory_space<vmem>>, %arg12: memref<3x4x32xf32, #tpu.memory_space<vmem>>, %arg13: memref<32x16xf32, #tpu.memory_space<vmem>>, %arg14: memref<1x16xf32, #tpu.memory_space<vmem>>, %arg15: memref<16x8xf32, #tpu.memory_space<vmem>>, %arg16: memref<1x8xf32, #tpu.memory_space<vmem>>, %arg17: memref<8x128xf32, #tpu.memory_space<vmem>>, %arg18: memref<1x128xf32, #tpu.memory_space<vmem>>, %arg19: memref<32x128xf32, #tpu.memory_space<vmem>>) attributes {dimension_semantics = [], scalar_prefetch = 0 : i64, scratch_operands = 0 : i64, tpu.core_type = #tpu.core_type<tc>} {
    %c0 = arith.constant 0 : index
    %c0_0 = arith.constant 0 : index
    %0 = vector.load %arg0[%c0, %c0_0] : memref<32x16xf32, #tpu.memory_space<vmem>>, vector<32x16xf32>
    %c0_1 = arith.constant 0 : index
    %c0_2 = arith.constant 0 : index
    %1 = vector.load %arg4[%c0_1, %c0_2] : memref<16x32xf32, #tpu.memory_space<vmem>>, vector<16x32xf32>
    %cst = arith.constant dense<0.000000e+00> : vector<32x32xf32>
    %2 = tpu.matmul %0, %1, %cst {dimension_numbers = #tpu.dot_dimension_numbers<[1], [0], [0], [1], [0, 0, 1, 1], [], []>} : vector<32x16xf32>, vector<16x32xf32>, vector<32x32xf32> -> vector<32x32xf32>
    %c0_3 = arith.constant 0 : index
    %c0_4 = arith.constant 0 : index
    %3 = vector.load %arg5[%c0_3, %c0_4] : memref<1x32xf32, #tpu.memory_space<vmem>>, vector<1x32xf32>
    %4 = vector.broadcast %3 : vector<1x32xf32> to vector<32x32xf32>
    %5 = arith.addf %2, %4 : vector<32x32xf32>
    %c0_5 = arith.constant 0 : index
    %c0_6 = arith.constant 0 : index
    %6 = vector.load %arg1[%c0_5, %c0_6] : memref<64x8xf32, #tpu.memory_space<vmem>>, vector<64x8xf32>
    %c0_7 = arith.constant 0 : index
    %c0_8 = arith.constant 0 : index
    %7 = vector.load %arg6[%c0_7, %c0_8] : memref<8x32xf32, #tpu.memory_space<vmem>>, vector<8x32xf32>
    %cst_9 = arith.constant dense<0.000000e+00> : vector<64x32xf32>
    %8 = tpu.matmul %6, %7, %cst_9 {dimension_numbers = #tpu.dot_dimension_numbers<[1], [0], [0], [1], [0, 0, 1, 1], [], []>} : vector<64x8xf32>, vector<8x32xf32>, vector<64x32xf32> -> vector<64x32xf32>
    %c0_10 = arith.constant 0 : index
    %c0_11 = arith.constant 0 : index
    %9 = vector.load %arg7[%c0_10, %c0_11] : memref<1x32xf32, #tpu.memory_space<vmem>>, vector<1x32xf32>
    %10 = vector.broadcast %9 : vector<1x32xf32> to vector<64x32xf32>
    %11 = arith.addf %8, %10 : vector<64x32xf32>
    %c0_12 = arith.constant 0 : index
    %c0_13 = arith.constant 0 : index
    %12 = vector.load %arg2[%c0_12, %c0_13] : memref<64x64xf32, #tpu.memory_space<vmem>>, vector<64x64xf32>
    %c0_14 = arith.constant 0 : index
    %c0_15 = arith.constant 0 : index
    %13 = vector.load %arg3[%c0_14, %c0_15] : memref<32x64xf32, #tpu.memory_space<vmem>>, vector<32x64xf32>
    %cst_16 = arith.constant 0.000000e+00 : f32
    %14 = vector.broadcast %cst_16 : f32 to vector<32x32xf32>
    %c0_17 = arith.constant 0 : index
    %c0_18 = arith.constant 0 : index
    %c0_19 = arith.constant 0 : index
    %15 = vector.load %arg8[%c0_17, %c0_18, %c0_19] : memref<3x32x128xf32, #tpu.memory_space<vmem>>, vector<1x32x128xf32>
    %16 = vector.shape_cast %15 : vector<1x32x128xf32> to vector<32x128xf32>
    %cst_20 = arith.constant dense<0.000000e+00> : vector<32x128xf32>
    %17 = tpu.matmul %5, %16, %cst_20 {dimension_numbers = #tpu.dot_dimension_numbers<[1], [0], [0], [1], [0, 0, 1, 1], [], []>} : vector<32x32xf32>, vector<32x128xf32>, vector<32x128xf32> -> vector<32x128xf32>
    %c0_21 = arith.constant 0 : index
    %c0_22 = arith.constant 0 : index
    %c0_23 = arith.constant 0 : index
    %18 = vector.load %arg9[%c0_21, %c0_22, %c0_23] : memref<3x1x128xf32, #tpu.memory_space<vmem>>, vector<1x1x128xf32>
    %19 = vector.shape_cast %18 : vector<1x1x128xf32> to vector<1x128xf32>
    %20 = vector.broadcast %19 : vector<1x128xf32> to vector<32x128xf32>
    %21 = arith.addf %17, %20 : vector<32x128xf32>
    %c0_24 = arith.constant 0 : index
    %c0_25 = arith.constant 0 : index
    %c0_26 = arith.constant 0 : index
    %22 = vector.load %arg10[%c0_24, %c0_25, %c0_26] : memref<3x32x32xf32, #tpu.memory_space<vmem>>, vector<1x32x32xf32>
    %23 = vector.shape_cast %22 : vector<1x32x32xf32> to vector<32x32xf32>
    %cst_27 = arith.constant dense<0.000000e+00> : vector<64x32xf32>
    %24 = tpu.matmul %11, %23, %cst_27 {dimension_numbers = #tpu.dot_dimension_numbers<[1], [0], [0], [1], [0, 0, 1, 1], [], []>} : vector<64x32xf32>, vector<32x32xf32>, vector<64x32xf32> -> vector<64x32xf32>
    %c0_28 = arith.constant 0 : index
    %c0_29 = arith.constant 0 : index
    %c0_30 = arith.constant 0 : index
    %25 = vector.load %arg11[%c0_28, %c0_29, %c0_30] : memref<3x1x32xf32, #tpu.memory_space<vmem>>, vector<1x1x32xf32>
    %26 = vector.shape_cast %25 : vector<1x1x32xf32> to vector<1x32xf32>
    %27 = vector.broadcast %26 : vector<1x32xf32> to vector<64x32xf32>
    %28 = arith.addf %24, %27 : vector<64x32xf32>
    %29 = vector.extract_strided_slice %21 {offsets = [0, 0], sizes = [32, 64], strides = [1, 1]} : vector<32x128xf32> to vector<32x64xf32>
    %30 = vector.extract_strided_slice %21 {offsets = [0, 64], sizes = [32, 32], strides = [1, 1]} : vector<32x128xf32> to vector<32x32xf32>
    %31 = tpu.concatenate %14, %30 in 1 : vector<32x32xf32>, vector<32x32xf32> -> vector<32x64xf32>
    %32 = tpu.concatenate %29, %31 in 0 : vector<32x64xf32>, vector<32x64xf32> -> vector<64x64xf32>
    %cst_31 = arith.constant dense<0.000000e+00> : vector<64x64xf32>
    %33 = tpu.matmul %12, %32, %cst_31 {dimension_numbers = #tpu.dot_dimension_numbers<[1], [0], [0], [1], [0, 0, 1, 1], [], []>} : vector<64x64xf32>, vector<64x64xf32>, vector<64x64xf32> -> vector<64x64xf32>
    %34 = vector.extract_strided_slice %33 {offsets = [0, 32], sizes = [64, 32], strides = [1, 1]} : vector<64x64xf32> to vector<64x32xf32>
    %35 = arith.addf %28, %34 : vector<64x32xf32>
    %36 = arith.negf %35 : vector<64x32xf32>
    %37 = math.exp %36 : vector<64x32xf32>
    %cst_32 = arith.constant 1.000000e+00 : f32
    %38 = vector.broadcast %cst_32 : f32 to vector<64x32xf32>
    %39 = arith.addf %38, %37 : vector<64x32xf32>
    %40 = arith.divf %38, %39 : vector<64x32xf32>
    %41 = vector.extract_strided_slice %33 {offsets = [0, 0], sizes = [64, 32], strides = [1, 1]} : vector<64x64xf32> to vector<64x32xf32>
    %42 = arith.mulf %40, %41 : vector<64x32xf32>
    %43 = tpu.concatenate %42, %40 in 1 : vector<64x32xf32>, vector<64x32xf32> -> vector<64x64xf32>
    %cst_33 = arith.constant dense<0.000000e+00> : vector<32x64xf32>
    %44 = tpu.matmul %13, %43, %cst_33 {dimension_numbers = #tpu.dot_dimension_numbers<[1], [0], [0], [1], [0, 0, 1, 1], [], []>} : vector<32x64xf32>, vector<64x64xf32>, vector<32x64xf32> -> vector<32x64xf32>
    %45 = vector.extract_strided_slice %21 {offsets = [0, 96], sizes = [32, 32], strides = [1, 1]} : vector<32x128xf32> to vector<32x32xf32>
    %46 = vector.extract_strided_slice %44 {offsets = [0, 0], sizes = [32, 32], strides = [1, 1]} : vector<32x64xf32> to vector<32x32xf32>
    %47 = vector.extract_strided_slice %44 {offsets = [0, 32], sizes = [32, 32], strides = [1, 1]} : vector<32x64xf32> to vector<32x32xf32>
    %cst_34 = arith.constant 9.99999997E-7 : f32
    %48 = vector.broadcast %cst_34 : f32 to vector<32x32xf32>
    %49 = arith.addf %47, %48 : vector<32x32xf32>
    %50 = arith.divf %46, %49 : vector<32x32xf32>
    %51 = arith.addf %45, %50 : vector<32x32xf32>
    %c0_35 = arith.constant 0 : index
    %c0_36 = arith.constant 0 : index
    %c0_37 = arith.constant 0 : index
    %52 = vector.load %arg12[%c0_35, %c0_36, %c0_37] : memref<3x4x32xf32, #tpu.memory_space<vmem>>, vector<1x4x32xf32>
    %53 = vector.shape_cast %52 : vector<1x4x32xf32> to vector<4x32xf32>
    %54 = vector.extract_strided_slice %53 {offsets = [0, 0], sizes = [1, 32], strides = [1, 1]} : vector<4x32xf32> to vector<1x32xf32>
    %55 = vector.broadcast %54 : vector<1x32xf32> to vector<32x32xf32>
    %56 = arith.mulf %51, %55 : vector<32x32xf32>
    %57 = vector.extract_strided_slice %53 {offsets = [1, 0], sizes = [1, 32], strides = [1, 1]} : vector<4x32xf32> to vector<1x32xf32>
    %58 = vector.broadcast %57 : vector<1x32xf32> to vector<32x32xf32>
    %59 = arith.addf %56, %58 : vector<32x32xf32>
    %60 = vector.extract_strided_slice %53 {offsets = [2, 0], sizes = [1, 32], strides = [1, 1]} : vector<4x32xf32> to vector<1x32xf32>
    %61 = vector.broadcast %60 : vector<1x32xf32> to vector<64x32xf32>
    %62 = arith.mulf %35, %61 : vector<64x32xf32>
    %63 = vector.extract_strided_slice %53 {offsets = [3, 0], sizes = [1, 32], strides = [1, 1]} : vector<4x32xf32> to vector<1x32xf32>
    %64 = vector.broadcast %63 : vector<1x32xf32> to vector<64x32xf32>
    %65 = arith.addf %62, %64 : vector<64x32xf32>
    %cst_38 = arith.constant 0.000000e+00 : f32
    %66 = vector.broadcast %cst_38 : f32 to vector<32x32xf32>
    %67 = arith.maximumf %59, %66 : vector<32x32xf32>
    %68 = arith.addf %5, %67 : vector<32x32xf32>
    %cst_39 = arith.constant 0.000000e+00 : f32
    %69 = vector.broadcast %cst_39 : f32 to vector<64x32xf32>
    %70 = arith.maximumf %65, %69 : vector<64x32xf32>
    %71 = arith.addf %11, %70 : vector<64x32xf32>
    %c1 = arith.constant 1 : index
    %c0_40 = arith.constant 0 : index
    %c0_41 = arith.constant 0 : index
    %72 = vector.load %arg8[%c1, %c0_40, %c0_41] : memref<3x32x128xf32, #tpu.memory_space<vmem>>, vector<1x32x128xf32>
    %73 = vector.shape_cast %72 : vector<1x32x128xf32> to vector<32x128xf32>
    %cst_42 = arith.constant dense<0.000000e+00> : vector<32x128xf32>
    %74 = tpu.matmul %68, %73, %cst_42 {dimension_numbers = #tpu.dot_dimension_numbers<[1], [0], [0], [1], [0, 0, 1, 1], [], []>} : vector<32x32xf32>, vector<32x128xf32>, vector<32x128xf32> -> vector<32x128xf32>
    %c1_43 = arith.constant 1 : index
    %c0_44 = arith.constant 0 : index
    %c0_45 = arith.constant 0 : index
    %75 = vector.load %arg9[%c1_43, %c0_44, %c0_45] : memref<3x1x128xf32, #tpu.memory_space<vmem>>, vector<1x1x128xf32>
    %76 = vector.shape_cast %75 : vector<1x1x128xf32> to vector<1x128xf32>
    %77 = vector.broadcast %76 : vector<1x128xf32> to vector<32x128xf32>
    %78 = arith.addf %74, %77 : vector<32x128xf32>
    %c1_46 = arith.constant 1 : index
    %c0_47 = arith.constant 0 : index
    %c0_48 = arith.constant 0 : index
    %79 = vector.load %arg10[%c1_46, %c0_47, %c0_48] : memref<3x32x32xf32, #tpu.memory_space<vmem>>, vector<1x32x32xf32>
    %80 = vector.shape_cast %79 : vector<1x32x32xf32> to vector<32x32xf32>
    %cst_49 = arith.constant dense<0.000000e+00> : vector<64x32xf32>
    %81 = tpu.matmul %71, %80, %cst_49 {dimension_numbers = #tpu.dot_dimension_numbers<[1], [0], [0], [1], [0, 0, 1, 1], [], []>} : vector<64x32xf32>, vector<32x32xf32>, vector<64x32xf32> -> vector<64x32xf32>
    %c1_50 = arith.constant 1 : index
    %c0_51 = arith.constant 0 : index
    %c0_52 = arith.constant 0 : index
    %82 = vector.load %arg11[%c1_50, %c0_51, %c0_52] : memref<3x1x32xf32, #tpu.memory_space<vmem>>, vector<1x1x32xf32>
    %83 = vector.shape_cast %82 : vector<1x1x32xf32> to vector<1x32xf32>
    %84 = vector.broadcast %83 : vector<1x32xf32> to vector<64x32xf32>
    %85 = arith.addf %81, %84 : vector<64x32xf32>
    %86 = vector.extract_strided_slice %78 {offsets = [0, 0], sizes = [32, 64], strides = [1, 1]} : vector<32x128xf32> to vector<32x64xf32>
    %87 = vector.extract_strided_slice %78 {offsets = [0, 64], sizes = [32, 32], strides = [1, 1]} : vector<32x128xf32> to vector<32x32xf32>
    %88 = tpu.concatenate %14, %87 in 1 : vector<32x32xf32>, vector<32x32xf32> -> vector<32x64xf32>
    %89 = tpu.concatenate %86, %88 in 0 : vector<32x64xf32>, vector<32x64xf32> -> vector<64x64xf32>
    %cst_53 = arith.constant dense<0.000000e+00> : vector<64x64xf32>
    %90 = tpu.matmul %12, %89, %cst_53 {dimension_numbers = #tpu.dot_dimension_numbers<[1], [0], [0], [1], [0, 0, 1, 1], [], []>} : vector<64x64xf32>, vector<64x64xf32>, vector<64x64xf32> -> vector<64x64xf32>
    %91 = vector.extract_strided_slice %90 {offsets = [0, 32], sizes = [64, 32], strides = [1, 1]} : vector<64x64xf32> to vector<64x32xf32>
    %92 = arith.addf %85, %91 : vector<64x32xf32>
    %93 = arith.negf %92 : vector<64x32xf32>
    %94 = math.exp %93 : vector<64x32xf32>
    %cst_54 = arith.constant 1.000000e+00 : f32
    %95 = vector.broadcast %cst_54 : f32 to vector<64x32xf32>
    %96 = arith.addf %95, %94 : vector<64x32xf32>
    %97 = arith.divf %95, %96 : vector<64x32xf32>
    %98 = vector.extract_strided_slice %90 {offsets = [0, 0], sizes = [64, 32], strides = [1, 1]} : vector<64x64xf32> to vector<64x32xf32>
    %99 = arith.mulf %97, %98 : vector<64x32xf32>
    %100 = tpu.concatenate %99, %97 in 1 : vector<64x32xf32>, vector<64x32xf32> -> vector<64x64xf32>
    %cst_55 = arith.constant dense<0.000000e+00> : vector<32x64xf32>
    %101 = tpu.matmul %13, %100, %cst_55 {dimension_numbers = #tpu.dot_dimension_numbers<[1], [0], [0], [1], [0, 0, 1, 1], [], []>} : vector<32x64xf32>, vector<64x64xf32>, vector<32x64xf32> -> vector<32x64xf32>
    %102 = vector.extract_strided_slice %78 {offsets = [0, 96], sizes = [32, 32], strides = [1, 1]} : vector<32x128xf32> to vector<32x32xf32>
    %103 = vector.extract_strided_slice %101 {offsets = [0, 0], sizes = [32, 32], strides = [1, 1]} : vector<32x64xf32> to vector<32x32xf32>
    %104 = vector.extract_strided_slice %101 {offsets = [0, 32], sizes = [32, 32], strides = [1, 1]} : vector<32x64xf32> to vector<32x32xf32>
    %cst_56 = arith.constant 9.99999997E-7 : f32
    %105 = vector.broadcast %cst_56 : f32 to vector<32x32xf32>
    %106 = arith.addf %104, %105 : vector<32x32xf32>
    %107 = arith.divf %103, %106 : vector<32x32xf32>
    %108 = arith.addf %102, %107 : vector<32x32xf32>
    %c1_57 = arith.constant 1 : index
    %c0_58 = arith.constant 0 : index
    %c0_59 = arith.constant 0 : index
    %109 = vector.load %arg12[%c1_57, %c0_58, %c0_59] : memref<3x4x32xf32, #tpu.memory_space<vmem>>, vector<1x4x32xf32>
    %110 = vector.shape_cast %109 : vector<1x4x32xf32> to vector<4x32xf32>
    %111 = vector.extract_strided_slice %110 {offsets = [0, 0], sizes = [1, 32], strides = [1, 1]} : vector<4x32xf32> to vector<1x32xf32>
    %112 = vector.broadcast %111 : vector<1x32xf32> to vector<32x32xf32>
    %113 = arith.mulf %108, %112 : vector<32x32xf32>
    %114 = vector.extract_strided_slice %110 {offsets = [1, 0], sizes = [1, 32], strides = [1, 1]} : vector<4x32xf32> to vector<1x32xf32>
    %115 = vector.broadcast %114 : vector<1x32xf32> to vector<32x32xf32>
    %116 = arith.addf %113, %115 : vector<32x32xf32>
    %117 = vector.extract_strided_slice %110 {offsets = [2, 0], sizes = [1, 32], strides = [1, 1]} : vector<4x32xf32> to vector<1x32xf32>
    %118 = vector.broadcast %117 : vector<1x32xf32> to vector<64x32xf32>
    %119 = arith.mulf %92, %118 : vector<64x32xf32>
    %120 = vector.extract_strided_slice %110 {offsets = [3, 0], sizes = [1, 32], strides = [1, 1]} : vector<4x32xf32> to vector<1x32xf32>
    %121 = vector.broadcast %120 : vector<1x32xf32> to vector<64x32xf32>
    %122 = arith.addf %119, %121 : vector<64x32xf32>
    %cst_60 = arith.constant 0.000000e+00 : f32
    %123 = vector.broadcast %cst_60 : f32 to vector<32x32xf32>
    %124 = arith.maximumf %116, %123 : vector<32x32xf32>
    %125 = arith.addf %68, %124 : vector<32x32xf32>
    %cst_61 = arith.constant 0.000000e+00 : f32
    %126 = vector.broadcast %cst_61 : f32 to vector<64x32xf32>
    %127 = arith.maximumf %122, %126 : vector<64x32xf32>
    %128 = arith.addf %71, %127 : vector<64x32xf32>
    %c2 = arith.constant 2 : index
    %c0_62 = arith.constant 0 : index
    %c0_63 = arith.constant 0 : index
    %129 = vector.load %arg8[%c2, %c0_62, %c0_63] : memref<3x32x128xf32, #tpu.memory_space<vmem>>, vector<1x32x128xf32>
    %130 = vector.shape_cast %129 : vector<1x32x128xf32> to vector<32x128xf32>
    %cst_64 = arith.constant dense<0.000000e+00> : vector<32x128xf32>
    %131 = tpu.matmul %125, %130, %cst_64 {dimension_numbers = #tpu.dot_dimension_numbers<[1], [0], [0], [1], [0, 0, 1, 1], [], []>} : vector<32x32xf32>, vector<32x128xf32>, vector<32x128xf32> -> vector<32x128xf32>
    %c2_65 = arith.constant 2 : index
    %c0_66 = arith.constant 0 : index
    %c0_67 = arith.constant 0 : index
    %132 = vector.load %arg9[%c2_65, %c0_66, %c0_67] : memref<3x1x128xf32, #tpu.memory_space<vmem>>, vector<1x1x128xf32>
    %133 = vector.shape_cast %132 : vector<1x1x128xf32> to vector<1x128xf32>
    %134 = vector.broadcast %133 : vector<1x128xf32> to vector<32x128xf32>
    %135 = arith.addf %131, %134 : vector<32x128xf32>
    %c2_68 = arith.constant 2 : index
    %c0_69 = arith.constant 0 : index
    %c0_70 = arith.constant 0 : index
    %136 = vector.load %arg10[%c2_68, %c0_69, %c0_70] : memref<3x32x32xf32, #tpu.memory_space<vmem>>, vector<1x32x32xf32>
    %137 = vector.shape_cast %136 : vector<1x32x32xf32> to vector<32x32xf32>
    %cst_71 = arith.constant dense<0.000000e+00> : vector<64x32xf32>
    %138 = tpu.matmul %128, %137, %cst_71 {dimension_numbers = #tpu.dot_dimension_numbers<[1], [0], [0], [1], [0, 0, 1, 1], [], []>} : vector<64x32xf32>, vector<32x32xf32>, vector<64x32xf32> -> vector<64x32xf32>
    %c2_72 = arith.constant 2 : index
    %c0_73 = arith.constant 0 : index
    %c0_74 = arith.constant 0 : index
    %139 = vector.load %arg11[%c2_72, %c0_73, %c0_74] : memref<3x1x32xf32, #tpu.memory_space<vmem>>, vector<1x1x32xf32>
    %140 = vector.shape_cast %139 : vector<1x1x32xf32> to vector<1x32xf32>
    %141 = vector.broadcast %140 : vector<1x32xf32> to vector<64x32xf32>
    %142 = arith.addf %138, %141 : vector<64x32xf32>
    %143 = vector.extract_strided_slice %135 {offsets = [0, 0], sizes = [32, 64], strides = [1, 1]} : vector<32x128xf32> to vector<32x64xf32>
    %144 = vector.extract_strided_slice %135 {offsets = [0, 64], sizes = [32, 32], strides = [1, 1]} : vector<32x128xf32> to vector<32x32xf32>
    %145 = tpu.concatenate %14, %144 in 1 : vector<32x32xf32>, vector<32x32xf32> -> vector<32x64xf32>
    %146 = tpu.concatenate %143, %145 in 0 : vector<32x64xf32>, vector<32x64xf32> -> vector<64x64xf32>
    %cst_75 = arith.constant dense<0.000000e+00> : vector<64x64xf32>
    %147 = tpu.matmul %12, %146, %cst_75 {dimension_numbers = #tpu.dot_dimension_numbers<[1], [0], [0], [1], [0, 0, 1, 1], [], []>} : vector<64x64xf32>, vector<64x64xf32>, vector<64x64xf32> -> vector<64x64xf32>
    %148 = vector.extract_strided_slice %147 {offsets = [0, 32], sizes = [64, 32], strides = [1, 1]} : vector<64x64xf32> to vector<64x32xf32>
    %149 = arith.addf %142, %148 : vector<64x32xf32>
    %150 = arith.negf %149 : vector<64x32xf32>
    %151 = math.exp %150 : vector<64x32xf32>
    %cst_76 = arith.constant 1.000000e+00 : f32
    %152 = vector.broadcast %cst_76 : f32 to vector<64x32xf32>
    %153 = arith.addf %152, %151 : vector<64x32xf32>
    %154 = arith.divf %152, %153 : vector<64x32xf32>
    %155 = vector.extract_strided_slice %147 {offsets = [0, 0], sizes = [64, 32], strides = [1, 1]} : vector<64x64xf32> to vector<64x32xf32>
    %156 = arith.mulf %154, %155 : vector<64x32xf32>
    %157 = tpu.concatenate %156, %154 in 1 : vector<64x32xf32>, vector<64x32xf32> -> vector<64x64xf32>
    %cst_77 = arith.constant dense<0.000000e+00> : vector<32x64xf32>
    %158 = tpu.matmul %13, %157, %cst_77 {dimension_numbers = #tpu.dot_dimension_numbers<[1], [0], [0], [1], [0, 0, 1, 1], [], []>} : vector<32x64xf32>, vector<64x64xf32>, vector<32x64xf32> -> vector<32x64xf32>
    %159 = vector.extract_strided_slice %135 {offsets = [0, 96], sizes = [32, 32], strides = [1, 1]} : vector<32x128xf32> to vector<32x32xf32>
    %160 = vector.extract_strided_slice %158 {offsets = [0, 0], sizes = [32, 32], strides = [1, 1]} : vector<32x64xf32> to vector<32x32xf32>
    %161 = vector.extract_strided_slice %158 {offsets = [0, 32], sizes = [32, 32], strides = [1, 1]} : vector<32x64xf32> to vector<32x32xf32>
    %cst_78 = arith.constant 9.99999997E-7 : f32
    %162 = vector.broadcast %cst_78 : f32 to vector<32x32xf32>
    %163 = arith.addf %161, %162 : vector<32x32xf32>
    %164 = arith.divf %160, %163 : vector<32x32xf32>
    %165 = arith.addf %159, %164 : vector<32x32xf32>
    %c2_79 = arith.constant 2 : index
    %c0_80 = arith.constant 0 : index
    %c0_81 = arith.constant 0 : index
    %166 = vector.load %arg12[%c2_79, %c0_80, %c0_81] : memref<3x4x32xf32, #tpu.memory_space<vmem>>, vector<1x4x32xf32>
    %167 = vector.shape_cast %166 : vector<1x4x32xf32> to vector<4x32xf32>
    %168 = vector.extract_strided_slice %167 {offsets = [0, 0], sizes = [1, 32], strides = [1, 1]} : vector<4x32xf32> to vector<1x32xf32>
    %169 = vector.broadcast %168 : vector<1x32xf32> to vector<32x32xf32>
    %170 = arith.mulf %165, %169 : vector<32x32xf32>
    %171 = vector.extract_strided_slice %167 {offsets = [1, 0], sizes = [1, 32], strides = [1, 1]} : vector<4x32xf32> to vector<1x32xf32>
    %172 = vector.broadcast %171 : vector<1x32xf32> to vector<32x32xf32>
    %173 = arith.addf %170, %172 : vector<32x32xf32>
    %cst_82 = arith.constant 0.000000e+00 : f32
    %174 = vector.broadcast %cst_82 : f32 to vector<32x32xf32>
    %175 = arith.maximumf %173, %174 : vector<32x32xf32>
    %176 = arith.addf %125, %175 : vector<32x32xf32>
    %c0_83 = arith.constant 0 : index
    %c0_84 = arith.constant 0 : index
    %177 = vector.load %arg13[%c0_83, %c0_84] : memref<32x16xf32, #tpu.memory_space<vmem>>, vector<32x16xf32>
    %cst_85 = arith.constant dense<0.000000e+00> : vector<32x16xf32>
    %178 = tpu.matmul %176, %177, %cst_85 {dimension_numbers = #tpu.dot_dimension_numbers<[1], [0], [0], [1], [0, 0, 1, 1], [], []>} : vector<32x32xf32>, vector<32x16xf32>, vector<32x16xf32> -> vector<32x16xf32>
    %c0_86 = arith.constant 0 : index
    %c0_87 = arith.constant 0 : index
    %179 = vector.load %arg14[%c0_86, %c0_87] : memref<1x16xf32, #tpu.memory_space<vmem>>, vector<1x16xf32>
    %180 = vector.broadcast %179 : vector<1x16xf32> to vector<32x16xf32>
    %181 = arith.addf %178, %180 : vector<32x16xf32>
    %cst_88 = arith.constant 0.000000e+00 : f32
    %182 = vector.broadcast %cst_88 : f32 to vector<32x16xf32>
    %183 = arith.maximumf %181, %182 : vector<32x16xf32>
    %c0_89 = arith.constant 0 : index
    %c0_90 = arith.constant 0 : index
    %184 = vector.load %arg15[%c0_89, %c0_90] : memref<16x8xf32, #tpu.memory_space<vmem>>, vector<16x8xf32>
    %cst_91 = arith.constant dense<0.000000e+00> : vector<32x8xf32>
    %185 = tpu.matmul %183, %184, %cst_91 {dimension_numbers = #tpu.dot_dimension_numbers<[1], [0], [0], [1], [0, 0, 1, 1], [], []>} : vector<32x16xf32>, vector<16x8xf32>, vector<32x8xf32> -> vector<32x8xf32>
    %c0_92 = arith.constant 0 : index
    %c0_93 = arith.constant 0 : index
    %186 = vector.load %arg16[%c0_92, %c0_93] : memref<1x8xf32, #tpu.memory_space<vmem>>, vector<1x8xf32>
    %187 = vector.broadcast %186 : vector<1x8xf32> to vector<32x8xf32>
    %188 = arith.addf %185, %187 : vector<32x8xf32>
    %cst_94 = arith.constant 0.000000e+00 : f32
    %189 = vector.broadcast %cst_94 : f32 to vector<32x8xf32>
    %190 = arith.maximumf %188, %189 : vector<32x8xf32>
    %c0_95 = arith.constant 0 : index
    %c0_96 = arith.constant 0 : index
    %191 = vector.load %arg17[%c0_95, %c0_96] : memref<8x128xf32, #tpu.memory_space<vmem>>, vector<8x128xf32>
    %cst_97 = arith.constant dense<0.000000e+00> : vector<32x128xf32>
    %192 = tpu.matmul %190, %191, %cst_97 {dimension_numbers = #tpu.dot_dimension_numbers<[1], [0], [0], [1], [0, 0, 1, 1], [], []>} : vector<32x8xf32>, vector<8x128xf32>, vector<32x128xf32> -> vector<32x128xf32>
    %c0_98 = arith.constant 0 : index
    %c0_99 = arith.constant 0 : index
    %193 = vector.load %arg18[%c0_98, %c0_99] : memref<1x128xf32, #tpu.memory_space<vmem>>, vector<1x128xf32>
    %194 = vector.broadcast %193 : vector<1x128xf32> to vector<32x128xf32>
    %195 = arith.addf %192, %194 : vector<32x128xf32>
    %c0_100 = arith.constant 0 : index
    %c0_101 = arith.constant 0 : index
    %196 = vector.load %arg19[%c0_100, %c0_101] : memref<32x128xf32, #tpu.memory_space<vmem>>, vector<32x128xf32>
    tpu.vector_store %arg19[%c0_100, %c0_101], %195 {strides = array<i32>} : memref<32x128xf32, #tpu.memory_space<vmem>>, vector<32x128xf32>,
    return
  }
}

</mosaic_0001>

<bundles_post_ra>
// kernel: tpu_custom_call.1
= control target key start
LH: loop header
LB: loop body
LE: loop exit
PB: predicated region body
PF: predicated region fallthrough
CT: control target
= control target key end

     0   :  { %s4303_s0 = inlined_call_operand.vmem [shape: f32[32,16], index: 0, kind: input, shape index: {}]   ;;  %s4304_s1 = inlined_call_operand.vmem [shape: f32[64,8], index: 1, kind: input, shape index: {}]   ;;  %s4305_s2 = inlined_call_operand.hbm [shape: f32[64,64], index: 2, kind: input, shape index: {}]   ;;  %s4306_s3 = inlined_call_operand.vmem [shape: f32[32,64], index: 3, kind: input, shape index: {}]   ;;  %s4307_s4 = inlined_call_operand.vmem [shape: f32[16,32], index: 4, kind: input, shape index: {}]   ;;  %s4308_s5 = inlined_call_operand.vmem [shape: f32[1,32], index: 5, kind: input, shape index: {}]   ;;  %s4309_s6 = inlined_call_operand.hbm [shape: f32[8,32], index: 6, kind: input, shape index: {}]   ;;  %s4310_s7 = inlined_call_operand.hbm [shape: f32[1,32], index: 7, kind: input, shape index: {}]   ;;  %s4311_s8 = inlined_call_operand.vmem [shape: f32[3,32,128], index: 8, kind: input, shape index: {}]   ;;  %s4312_s9 = inlined_call_operand.hbm [shape: f32[3,1,128], index: 9, kind: input, shape index: {}]   ;;  %s4313_s10 = inlined_call_operand.hbm [shape: f32[3,32,32], index: 10, kind: input, shape index: {}]   ;;  %s4314_s11 = inlined_call_operand.hbm [shape: f32[3,1,32], index: 11, kind: input, shape index: {}]   ;;  %s4315_s12 = inlined_call_operand.vmem [shape: f32[3,4,32], index: 12, kind: input, shape index: {}]   ;;  %s4316_s13 = inlined_call_operand.vmem [shape: f32[32,16], index: 13, kind: input, shape index: {}]   ;;  %s4317_s14 = inlined_call_operand.vmem [shape: f32[1,16], index: 14, kind: input, shape index: {}]   ;;  %s4318_s15 = inlined_call_operand.vmem [shape: f32[16,8], index: 15, kind: input, shape index: {}]   ;;  %s4319_s16 = inlined_call_operand.hbm [shape: f32[1,8], index: 16, kind: input, shape index: {}]   ;;  %s4320_s17 = inlined_call_operand.hbm [shape: f32[8,128], index: 17, kind: input, shape index: {}]   ;;  %s4321_s18 = inlined_call_operand.vmem [shape: f32[1,128], index: 18, kind: input, shape index: {}]   ;;  %s4322_s19 = inlined_call_operand.hbm [shape: f32[32,128], index: 19, kind: output, shape index: {}]  }
   0x1   :  { %4338 = sst [smem:[#allocation33_spill]] %s4303_s0 }
   0x2   :  { %4339 = sst [smem:[#allocation34_spill]] %s4304_s1 }
   0x3   :  { %4340 = sst [smem:[#allocation35_spill]] %s4305_s2 }
   0x4   :  { %4341 = sst [smem:[#allocation36_spill]] %s4306_s3 }
   0x5   :  { %24 = vsyncpa [#allocation3], 0 }
   0x6   :  { %25 = vsyncpa [#allocation6], 0 }
   0x7   :  { %26 = vsyncpa [#allocation9], 0 }
   0x8   :  { %27 = vsyncpa [#allocation12], 0 }
   0x9   :  { %28 = vsyncpa [#allocation15], 0  ;;  %s58_s20 = sshll.u32 %s4309_s6, 4  ;;  %s59_s20 = int_to_ptr.hbm [resolvable:$true] %s58_s20 }
   0xa   :  { %29 = vsyncpa [#allocation4], 0  ;;  %s3001_s21 = smov [#allocation5]   ;;  %s81_s23 = sshll.u32 %s4312_s9, 4  ;;  %s82_s23 = int_to_ptr.hbm [resolvable:$true] %s81_s23 }
   0xb   :  { %s60_s1 = sshll.u32 %s3001_s21, 4  ;;  %s3002_s24 = smov [#allocation8]   ;;  %s61_s1 = int_to_ptr.vmem [resolvable:$true] %s60_s1 }
   0xc   :  { %63 = dma.hbm_to_vmem [thread:$0]  %s59_s20, 128, %s61_s1, [#allocation6]  }
   0xd   :  { %s83_s25 = sshll.u32 %s3002_s24, 4  ;;  %s3003_s3 = smov 16   ;;  %s84_s25 = int_to_ptr.vmem [resolvable:$true] %s83_s25 }
   0xe   :  { %s3004_s26 = smov 1   ;;  %s107_s6 = sshll.u32 %s4314_s11, 4  ;;  %s108_s6 = int_to_ptr.hbm [resolvable:$true] %s107_s6 }
   0xf   :  { %89 = dma.hbm_to_vmem [thread:$0]  %s82_s23, 48, %s84_s25, [#allocation9], %s3003_s3, %s3003_s3, %s3004_s26  }
  0x10   :  { %s3005_s29 = smov [#allocation11]   ;;  %s4342_s22 = sld [smem:[#allocation35_spill]] }
  0x11   :  { %s109_s0 = sshll.u32 %s3005_s29, 4  ;;  %s3006_s20 = smov [#allocation2]   ;;  %s110_s0 = int_to_ptr.vmem [resolvable:$true] %s109_s0 }
  0x12   :  { %115 = dma.hbm_to_vmem [thread:$0]  %s108_s6, 48, %s110_s0, [#allocation12], %s3003_s3, %s3003_s3, %s3004_s26  }
  0x13   :  { %s40_s1 = sshll.u32 %s3006_s20, 4  ;;  %s3007_s2 = smov 128   ;;  %s41_s1 = int_to_ptr.vmem [resolvable:$true] %s40_s1 }
  0x14   :  { %s3008_s24 = smov 8   ;;  %s69_s25 = sshll.u32 %s4310_s7, 4  ;;  %s70_s25 = int_to_ptr.hbm [resolvable:$true] %s69_s25 }
  0x15   :  { %s3009_s27 = smov [#allocation7]   ;;  %s94_s26 = sshll.u32 %s4313_s10, 4  ;;  %s95_s26 = int_to_ptr.hbm [resolvable:$true] %s94_s26 }
  0x16   :  { %s38_s9 = sshll.u32 %s4342_s22, 4  ;;  %s71_s28 = sshll.u32 %s3009_s27, 4  ;;  %s39_s9 = int_to_ptr.hbm [resolvable:$true] %s38_s9  ;;  %s72_s28 = int_to_ptr.vmem [resolvable:$true] %s71_s28 }
  0x17   :  { %46 = dma.hbm_to_vmem [thread:$0]  %s39_s9, 1024, %s41_s1, [#allocation3], %s3007_s2, %s3007_s2, %s3008_s24  }
  0x18   :  { %74 = dma.hbm_to_vmem [thread:$0]  %s70_s25, 16, %s72_s28, [#allocation6]  }
  0x19   :  { %s3010_s6 = smov [#allocation10]   ;;  %s129_s22 = sshll.u32 %s4319_s16, 4  ;;  %s130_s22 = int_to_ptr.hbm [resolvable:$true] %s129_s22 }
  0x1a   :  { %s96_s0 = sshll.u32 %s3010_s6, 4  ;;  %s140_s20 = sshll.u32 %s4320_s17, 4  ;;  %s97_s0 = int_to_ptr.vmem [resolvable:$true] %s96_s0  ;;  %s141_s20 = int_to_ptr.hbm [resolvable:$true] %s140_s20 }
  0x1b   :  { %102 = dma.hbm_to_vmem [thread:$0]  %s95_s26, 1536, %s97_s0, [#allocation9], %s3007_s2, %s3007_s2, %s3008_s24  }
  0x1c   :  { %s3011_s1 = smov [#allocation13]   ;;  %s3012_s11 = smov [#allocation14]  }
  0x1d   :  { %s131_s10 = sshll.u32 %s3011_s1, 4  ;;  %s142_s23 = sshll.u32 %s3012_s11, 4  ;;  %s132_s10 = int_to_ptr.vmem [resolvable:$true] %s131_s10  ;;  %s143_s23 = int_to_ptr.vmem [resolvable:$true] %s142_s23 }
  0x1e   :  { %134 = dma.hbm_to_vmem [thread:$0]  %s130_s22, 16, %s132_s10, [#allocation12]  }
  0x1f   :  { %145 = dma.hbm_to_vmem [thread:$0]  %s141_s20, 128, %s143_s23, [#allocation15]  }
  0x20   :  { %2989 = dma.done.wait [#allocation3], 1024  }
  0x21   :  { %2990 = vsyncadd [#allocation3], 4294966272 }
  0x22   :  { %2991 = dma.done.wait [#allocation6], 144  }
  0x23   :  { %2992 = vsyncadd [#allocation6], 4294967152 }
  0x24   :  { %2993 = dma.done.wait [#allocation9], 1584  }
  0x25   :  { %2994 = vsyncadd [#allocation9], 4294965712 }
  0x26   :  { %2995 = dma.done.wait [#allocation12], 64  }
  0x27   :  { %2996 = vsyncadd [#allocation12], 4294967232 }
  0x28   :  { %2997 = dma.done.wait [#allocation15], 128  }
  0x29   :  { %2998 = vsyncadd [#allocation15], 4294967168  ;;  %v185_v0 = vld [vmem:[%s4307_s4 + $0x8] sm:$0xff]  ;;  %v184_v1 = vld [vmem:[%s4307_s4] sm:$0xff]  ;;  %s4343_s3 = sld [smem:[#allocation33_spill]]  ;;  %vm190_vm0 = vcmask 130048  }
  0x2a   :  { %217 = vmatpush.msra.mxu0 %v185_v0  ;;  %v326_v3 = vld [vmem:[%s4311_s8 + $0x18] sm:$0xff]  ;;  %v325_v4 = vld [vmem:[%s4311_s8 + $0x10] sm:$0xff]  ;;  %v324_v8 = vld [vmem:[%s4311_s8 + $0x8] sm:$0xff]  ;;  %vm331_vm1 = vcmask 261120   ;;  %s4344_s27 = sld [smem:[#allocation34_spill]]  ;;  %vm245_vm2 = vcmask 64512  }
  0x2b   :  { %356 = vmatpush.msra.mxu2 %v326_v3  ;;  %v323_v9 = vld [vmem:[%s4311_s8] sm:$0xff]  ;;  %v2631_v22 = vld [vmem:[#allocation8] ss:$0 sm:$0xff]  ;;  %s3013_s28 = smov 96   ;;  %vm3244_vm3 = vmneg %vm331_vm1  ;;  %v4345_v36 = vmov 0  ;;  %vm466_vm4 = vcmask 523264  }
  0x2c   :  { %218 = vmatpush.msra.mxu0 %v184_v1  ;;  %v2630_v10 = vld [vmem:[%s4308_s5] ss:$0 sm:$0xff]  ;;  %v4346_v36 = vsel %vm3244_vm3, 4294967295, %v4345_v36  ;;  %v312_v43 = vld [vmem:[#allocation2 + $0x8] sm:$0xff]  ;;  %v3266_v44 = vld [vmem:[#allocation2 + $0x10] sm:$0xff]  ;;  %s3014_s11 = smov 32  }
  0x2d   :  { %357 = vmatpush.msra.mxu2 %v325_v4  ;;  %v240_v20 = vld [vmem:[#allocation5] sm:$0xff]  ;;  %4347 = vst [vmem:[#allocation23_spill] sm:$0xff] %v4346_v36  ;;  %v3270_v45 = vld [vmem:[#allocation2 + $0x18] sm:$0xff]  ;;  %v2632_v48 = vld [vmem:[#allocation7] ss:$0 sm:$0xff]  ;;  %s4370_s17 = sld [smem:[#allocation36_spill]] }
  0x2e   :  { %285 = vmatpush.msra.mxu1 %v240_v20  ;;  %v311_v42 = vld [vmem:[#allocation2] sm:$0xff]  ;;  %4348 = vst [vmem:[#allocation24_spill] sm:$0xff] %v3266_v44  ;;  %v374_v50 = vld [vmem:[#allocation10 + $0x8] sm:$0xff]  ;;  %v373_v52 = vld [vmem:[#allocation10] sm:$0xff]  ;;  %s3015_s6 = smov [#allocation16]   ;;  %s2384_s4 = sshll.u32 %s4322_s19, 4  ;;  %s2385_s4 = int_to_ptr.hbm [resolvable:$true] %s2384_s4 }
  0x2f   :  { %v180_v2 = vld [vmem:[%s4343_s3] sm:$0xff]  ;;  %v181_v5 = vld [vmem:[%s4343_s3 + $0x8] sm:$0xff]  ;;  %v182_v6 = vld [vmem:[%s4343_s3 + $0x10] sm:$0xff]  ;;  %358 = vmatpush.msra.mxu2 %v324_v8  ;;  %4349 = vst [vmem:[#allocation25_spill] sm:$0xff] %v3270_v45 }
  0x30   :  { %2401 = vmatmul.msk.f32.vlgmr.msra.gmra.mxu0 %vm190_vm0, %v180_v2  ;;  %v183_v7 = vld [vmem:[%s4343_s3 + $0x18] sm:$0xff]  ;;  %v232_v21 = vld [vmem:[%s4344_s27] sm:$0xff]  ;;  %v233_v30 = vld [vmem:[%s4344_s27 + $0x8] sm:$0xff] }
  0x31   :  { %359 = vmatpush.msra.mxu2 %v323_v9  ;;  %2405 = vmatmul.msk.f32.vlgmr.msra.gmra.mxu1 %vm245_vm2, %v232_v21  ;;  %v234_v31 = vld [vmem:[%s4344_s27 + $0x10] sm:$0xff]  ;;  %v235_v32 = vld [vmem:[%s4344_s27 + $0x18] sm:$0xff]  ;;  %v236_v33 = vld [vmem:[%s4344_s27 + $0x20] sm:$0xff] }
  0x32   :  { %v237_v34 = vld [vmem:[%s4344_s27 + $0x28] sm:$0xff]  ;;  %v238_v35 = vld [vmem:[%s4344_s27 + $0x30] sm:$0xff]  ;;  %v239_v37 = vld [vmem:[%s4344_s27 + $0x38] sm:$0xff] }
  0x33   :  { %v376_v46 = vld [vmem:[#allocation10 + $0x18] sm:$0xff]  ;;  %v375_v47 = vld [vmem:[#allocation10 + $0x10] sm:$0xff]  ;;  %v3286_v55 = vld [vmem:[#allocation2 + $0x30] sm:$0xff] }
  0x34   :  { %417 = vmatpush.msra.mxu3 %v376_v46  ;;  %v3276_v53 = vld [vmem:[#allocation2 + $0x20] sm:$0xff]  ;;  %v3282_v54 = vld [vmem:[#allocation2 + $0x28] sm:$0xff]  ;;  %4352 = vst [vmem:[#allocation28_spill] sm:$0xff] %v3286_v55  ;;  %v3290_v56 = vld [vmem:[#allocation2 + $0x38] sm:$0xff] }
  0x35   :  { %4350 = vst [vmem:[#allocation26_spill] sm:$0xff] %v3276_v53 }
  0x36   :  { %418 = vmatpush.msra.mxu3 %v375_v47  ;;  %4351 = vst [vmem:[#allocation27_spill] sm:$0xff] %v3282_v54 }
  0x37   :  { %4353 = vst [vmem:[#allocation29_spill] sm:$0xff] %v3290_v56 }
  0x38   :  { %2402 = vmatmul.msk.f32.gmra.mxu0 %vm190_vm0, %v181_v5  ;;  %419 = vmatpush.msra.mxu3 %v374_v50 }
  0x39   :  { %2406 = vmatmul.msk.f32.gmra.mxu1 %vm245_vm2, %v233_v30  ;;  %v2633_v30 = vld [vmem:[#allocation11] ss:$0 sm:$0xff] }
  0x3a   :  { %420 = vmatpush.msra.mxu3 %v373_v52 }
  0x40   :  { %2403 = vmatmul.msk.f32.gmra.mxu0 %vm190_vm0, %v182_v6 }
  0x41   :  { %2407 = vmatmul.msk.f32.gmra.mxu1 %vm245_vm2, %v234_v31 }
  0x48   :  { %2404 = vmatmul.msk.f32.gmra.mxu0 %vm190_vm0, %v183_v7 }
  0x49   :  { %2408 = vmatmul.msk.f32.gmra.mxu1 %vm245_vm2, %v235_v32 }
  0x51   :  { %2409 = vmatmul.msk.f32.gmra.mxu1 %vm245_vm2, %v236_v33 }
  0x59   :  { %2410 = vmatmul.msk.f32.gmra.mxu1 %vm245_vm2, %v237_v34 }
  0x61   :  { %2411 = vmatmul.msk.f32.gmra.mxu1 %vm245_vm2, %v238_v35 }
  0x69   :  { %2412 = vmatmul.msk.f32.gmra.mxu1 %vm245_vm2, %v239_v37 }
  0xad   :  { %v220_v11 = vpop.f32.mrf.mxu0 }
  0xae   :  { %v3183_v12 = vadd.f32 %v2630_v10, %v220_v11  ;;  %v287_v49 = vpop.f32.mrf.mxu1 }
  0xaf   :  { %v3274_v51 = vadd.f32 %v2632_v48, %v287_v49 }
  0xb0   :  { %2413 = vmatmul.msk.f32.vlgmr.msra.gmra.mxu2 %vm331_vm1, %v3183_v12 }
  0xb1   :  { %2417 = vmatmul.msk.f32.vlgmr.msra.gmra.mxu3 %vm331_vm1, %v3274_v51 }
  0xb5   :  { %v223_v13 = vpop.f32.mrf.mxu0 }
  0xb6   :  { %v3187_v14 = vadd.f32 %v2630_v10, %v223_v13  ;;  %v290_v57 = vpop.f32.mrf.mxu1 }
  0xb7   :  { %v3294_v58 = vadd.f32 %v2632_v48, %v290_v57 }
  0xb8   :  { %2414 = vmatmul.msk.f32.gmra.mxu2 %vm331_vm1, %v3187_v14 }
  0xb9   :  { %2418 = vmatmul.msk.f32.gmra.mxu3 %vm331_vm1, %v3294_v58 }
  0xbd   :  { %v226_v15 = vpop.f32.mrf.mxu0 }
  0xbe   :  { %v3191_v16 = vadd.f32 %v2630_v10, %v226_v15  ;;  %v293_v59 = vpop.f32.mrf.mxu1 }
  0xbf   :  { %v3298_v60 = vadd.f32 %v2632_v48, %v293_v59 }
  0xc0   :  { %2415 = vmatmul.msk.f32.gmra.mxu2 %vm331_vm1, %v3191_v16 }
  0xc1   :  { %2419 = vmatmul.msk.f32.gmra.mxu3 %vm331_vm1, %v3298_v60 }
  0xc5   :  { %v229_v17 = vpop.f32.mrf.mxu0 }
  0xc6   :  { %v3195_v18 = vadd.f32 %v2630_v10, %v229_v17  ;;  %v296_v61 = vpop.f32.mrf.mxu1 }
  0xc7   :  { %v3302_v62 = vadd.f32 %v2632_v48, %v296_v61 }
  0xc8   :  { %2416 = vmatmul.msk.f32.gmra.mxu2 %vm331_vm1, %v3195_v18 }
  0xc9   :  { %2420 = vmatmul.msk.f32.gmra.mxu3 %vm331_vm1, %v3302_v62 }
  0xce   :  { %v299_v63 = vpop.f32.mrf.mxu1 }
  0xcf   :  { %v3306_v0 = vadd.f32 %v2632_v48, %v299_v63 }
  0xd1   :  { %2421 = vmatmul.msk.f32.gmra.mxu3 %vm331_vm1, %v3306_v0 }
  0xd6   :  { %v302_v1 = vpop.f32.mrf.mxu1 }
  0xd7   :  { %v3310_v2 = vadd.f32 %v2632_v48, %v302_v1 }
  0xd9   :  { %2422 = vmatmul.msk.f32.gmra.mxu3 %vm331_vm1, %v3310_v2 }
  0xde   :  { %v305_v3 = vpop.f32.mrf.mxu1 }
  0xdf   :  { %v3314_v4 = vadd.f32 %v2632_v48, %v305_v3 }
  0xe1   :  { %2423 = vmatmul.msk.f32.gmra.mxu3 %vm331_vm1, %v3314_v4 }
  0xe6   :  { %v308_v5 = vpop.f32.mrf.mxu1 }
  0xe7   :  { %v3318_v6 = vadd.f32 %v2632_v48, %v308_v5 }
  0xe9   :  { %2424 = vmatmul.msk.f32.gmra.mxu3 %vm331_vm1, %v3318_v6 }
 0x133   :  { %v361_v19 = vpop.f32.mrf.mxu2 }
 0x134   :  { %v3207_v26 = vadd.f32 %v2631_v22, %v361_v19  ;;  %v422_v19 = vpop.f32.mrf.mxu3 }
 0x13b   :  { %v364_v23 = vpop.f32.mrf.mxu2 }
 0x13c   :  { %v3203_v24 = vadd.f32 %v2631_v22, %v364_v23  ;;  %v425_v20 = vpop.f32.mrf.mxu3 }
 0x13d   :  { %v426_v49 = vadd.f32 %v2633_v30, %v425_v20 }
 0x13e   :  { %452 = vrot.lane.b32.xlu1 %v3203_v24, %s3013_s28 }
 0x143   :  { %v367_v25 = vpop.f32.mrf.mxu2 }
 0x144   :  { %v3215_v29 = vadd.f32 %v2631_v22, %v367_v25  ;;  %v428_v21 = vpop.f32.mrf.mxu3 }
 0x146   :  { %450 = vrot.lane.b32.xlu1 %v3207_v26, %s3013_s28 }
 0x14b   :  { %v370_v27 = vpop.f32.mrf.mxu2 }
 0x14c   :  { %v3211_v28 = vadd.f32 %v2631_v22, %v370_v27  ;;  %v431_v22 = vpop.f32.mrf.mxu3 }
 0x14d   :  { %v432_v52 = vadd.f32 %v2633_v30, %v431_v22 }
 0x14e   :  { %456 = vrot.lane.b32.xlu0 %v3211_v28, %s3013_s28 }
 0x154   :  { %v434_v23 = vpop.f32.mrf.mxu3 }
 0x156   :  { %454 = vrot.lane.b32.xlu0 %v3215_v29, %s3013_s28 }
 0x15c   :  { %v437_v25 = vpop.f32.mrf.mxu3 }
 0x15d   :  { %v438_v50 = vadd.f32 %v2633_v30, %v437_v25 }
 0x164   :  { %v440_v27 = vpop.f32.mrf.mxu3 }
 0x165   :  { %v441_v31 = vadd.f32 %v2633_v30, %v440_v27 }
 0x16c   :  { %v443_v34 = vpop.f32.mrf.mxu3 }
 0x16d   :  { %v444_v37 = vadd.f32 %v2633_v30, %v443_v34 }
 0x1b0   :  { %v453_v39 = vpop.permute.xlu1 %452 }
 0x1b8   :  { %v451_v41 = vpop.permute.xlu1 %450 }
 0x1c0   :  { %v457_v38 = vpop.permute.xlu0 %456 }
 0x1c1   :  { %2426 = vmatpush.msk.msrb.mxu0 %vm3244_vm3, %v457_v38  ;;  %v435_v38 = vadd.f32 %v2633_v30, %v434_v23 }
 0x1c8   :  { %v455_v40 = vpop.permute.xlu0 %454 }
 0x1c9   :  { %2428 = vmatpush.msk.msrb.mxu0 %vm3244_vm3, %v455_v40 }
 0x1cb   :  { %2430 = vmatpush.msk.msrb.mxu0 %vm3244_vm3, %v453_v39 }
 0x1cd   :  { %2432 = vmatpush.msk.msrb.mxu0 %vm3244_vm3, %v451_v41 }
 0x1cf   :  { %503 = vmatpush.msrb.mxu0 %v3211_v28 }
 0x1d1   :  { %504 = vmatpush.msrb.mxu0 %v3215_v29 }
 0x1d3   :  { %505 = vmatpush.msrb.mxu0 %v3203_v24 }
 0x1d5   :  { %506 = vmatpush.msrb.mxu0 %v3207_v26 }
 0x1d6   :  { %2433 = vmatmul.msk.f32.vlgmr.msrb.gmra.mxu0 %vm466_vm4, %v311_v42 }
 0x1de   :  { %2434 = vmatmul.msk.f32.gmra.mxu0 %vm466_vm4, %v312_v43 }
 0x1e6   :  { %2435 = vmatmul.msk.f32.gmra.mxu0 %vm466_vm4, %v3266_v44 }
 0x1ee   :  { %2436 = vmatmul.msk.f32.gmra.mxu0 %vm466_vm4, %v3270_v45 }
 0x1f6   :  { %2437 = vmatmul.msk.f32.gmra.mxu0 %vm466_vm4, %v3276_v53 }
 0x1fe   :  { %2438 = vmatmul.msk.f32.gmra.mxu0 %vm466_vm4, %v3282_v54 }
 0x206   :  { %2439 = vmatmul.msk.f32.gmra.mxu0 %vm466_vm4, %v3286_v55 }
 0x20e   :  { %2440 = vmatmul.msk.f32.gmra.mxu0 %vm466_vm4, %v3290_v56 }
 0x253   :  { %v3322_v7 = vpop.f32.mrf.mxu0 }
 0x25b   :  { %v3324_v8 = vpop.f32.mrf.mxu0 }
 0x263   :  { %v3326_v9 = vpop.f32.mrf.mxu0 }
 0x26b   :  { %v3328_v10 = vpop.f32.mrf.mxu0 }
 0x273   :  { %v3330_v11 = vpop.f32.mrf.mxu0 }
 0x274   :  { %548 = vrot.lane.b32.xlu1 %v3330_v11, %s3013_s28 }
 0x27b   :  { %v3334_v13 = vpop.f32.mrf.mxu0 }
 0x27c   :  { %542 = vrot.lane.b32.xlu1 %v3324_v8, %s3013_s28  ;;  %550 = vrot.lane.b32.xlu0 %v3334_v13, %s3013_s28 }
 0x283   :  { %v3340_v15 = vpop.f32.mrf.mxu0 }
 0x284   :  { %544 = vrot.lane.b32.xlu0 %v3326_v9, %s3013_s28  ;;  %552 = vrot.lane.b32.xlu2 %v3340_v15, %s3013_s28 }
 0x28b   :  { %v3346_v17 = vpop.f32.mrf.mxu0 }
 0x28c   :  { %554 = vrot.lane.b32.xlu2 %v3346_v17, %s3013_s28 }
 0x294   :  { %546 = vrot.lane.b32.xlu2 %v3328_v10, %s3013_s28 }
 0x29c   :  { %540 = vrot.lane.b32.xlu2 %v3322_v7, %s3013_s28 }
 0x2de   :  { %v553_v32 = vpop.permute.xlu2 %552 }
 0x2df   :  { %v3354_v33 = vadd.f32 %v553_v32, %v441_v31 }
 0x2e1   :  { %v2447_v35 = vmul.f32 -1.442695, %v3354_v33 }
 0x2e3   :  { %2641 = vpow2.f32 %v2447_v35  ;;  %v429_v35 = vadd.f32 %v2633_v30, %v428_v21 }
 0x2e6   :  { %v549_v39 = vpop.permute.xlu1 %548  ;;  %v555_v40 = vpop.permute.xlu2 %554 }
 0x2e7   :  { %v3357_v41 = vadd.f32 %v549_v39, %v435_v38  ;;  %v3359_v42 = vadd.f32 %v555_v40, %v444_v37  ;;  %v423_v37 = vadd.f32 %v2633_v30, %v422_v19 }
 0x2e9   :  { %v2642_v43 = vpop.eup %2641  ;;  %v2445_v46 = vmul.f32 -1.442695, %v3357_v41  ;;  %v2448_v47 = vmul.f32 -1.442695, %v3359_v42 }
 0x2ea   :  { %v3363_v48 = vadd.f32 1.0, %v2642_v43 }
 0x2eb   :  { %2643 = vpow2.f32 %v2445_v46 }
 0x2ec   :  { %2645 = vrcp.f32 %v3363_v48  ;;  %vm699_vm6 = vweird.f32 %v3363_v48 }
 0x2ed   :  { %2647 = vpow2.f32 %v2448_v47 }
 0x2ee   :  { %v543_v57 = vpop.permute.xlu1 %542  ;;  %v551_v59 = vpop.permute.xlu0 %550 }
 0x2ef   :  { %v3366_v61 = vadd.f32 %v543_v57, %v426_v49  ;;  %v3368_v63 = vadd.f32 %v551_v59, %v438_v50  ;;  %v547_v1 = vpop.permute.xlu2 %546 }
 0x2f0   :  { %v3370_v3 = vadd.f32 %v547_v1, %v432_v52 }
 0x2f1   :  { %v2644_v5 = vpop.eup %2643  ;;  %v2442_v23 = vmul.f32 -1.442695, %v3366_v61  ;;  %v2446_v27 = vmul.f32 -1.442695, %v3368_v63 }
 0x2f2   :  { %v3374_v31 = vpop.eup %2645  ;;  %v3376_v20 = vadd.f32 1.0, %v2644_v5  ;;  %v2444_v22 = vmul.f32 -1.442695, %v3370_v3  ;;  %v703_v5 = vand.u32 2147483647, %v3363_v48 }
 0x2f3   :  { %v2648_v25 = vpop.eup %2647  ;;  %2649 = vpow2.f32 %v2442_v23  ;;  %v695_v32 = vmul.f32 %v3374_v31, %v3363_v48  ;;  %v705_v23 = vand.u32 2147483648, %v3363_v48  ;;  %vm700_vm5 = vweird.f32 %v3374_v31 }
 0x2f4   :  { %2651 = vrcp.f32 %v3376_v20  ;;  %v603_v34 = vadd.f32 1.0, %v2648_v25  ;;  %vm3407_vm7 = vcmp.eq.f32.partialorder %v703_v5, 8.507059e+37  ;;  %vm3414_vm8 = vmor %vm699_vm6, %vm700_vm5  ;;  %v673_v48 = vand.u32 2147483647, %v3376_v20 }
 0x2f5   :  { %2653 = vpow2.f32 %v2446_v27  ;;  %v696_v39 = vsub.f32 1.0, %v695_v32  ;;  %vm669_vm12 = vweird.f32 %v3376_v20  ;;  %v675_v56 = vand.u32 2147483648, %v3376_v20 }
 0x2f6   :  { %2655 = vrcp.f32 %v603_v34  ;;  %v545_v38 = vpop.permute.xlu0 %544  ;;  %vm714_vm9 = vweird.f32 %v603_v34  ;;  %vm3444_vm15 = vcmp.eq.f32.partialorder %v673_v48, 8.507059e+37 }
 0x2f7   :  { %2657 = vpow2.f32 %v2444_v22  ;;  %v3382_v40 = vadd.f32 %v545_v38, %v429_v35  ;;  %v541_v43 = vpop.permute.xlu2 %540  ;;  %v697_v19 = vmul.f32 %v3374_v31, %v696_v39  ;;  %v718_v22 = vand.u32 2147483647, %v603_v34 }
 0x2f8   :  { %v3384_v46 = vadd.f32 %v541_v43, %v423_v37  ;;  %v720_v39 = vand.u32 2147483648, %v603_v34 }
 0x2f9   :  { %v2650_v47 = vpop.eup %2649  ;;  %v2443_v49 = vmul.f32 -1.442695, %v3382_v40  ;;  %v698_v35 = vadd.f32 %v3374_v31, %v697_v19  ;;  %vm3426_vm11 = vcmp.eq.f32.partialorder %v718_v22, 8.507059e+37 }
 0x2fa   :  { %v3387_v50 = vpop.eup %2651  ;;  %v3389_v52 = vadd.f32 1.0, %v2650_v47  ;;  %v2441_v21 = vmul.f32 -1.442695, %v3384_v46  ;;  %v706_v47 = vor.u32 1.1754944e-38, %v705_v23 }
 0x2fb   :  { %v2654_v30 = vpop.eup %2653  ;;  %2659 = vpow2.f32 %v2443_v49  ;;  %v665_v57 = vmul.f32 %v3387_v50, %v3376_v20  ;;  %v702_v23 = vsel %vm3414_vm8, %v3374_v31, %v698_v35  ;;  %vm670_vm13 = vweird.f32 %v3387_v50 }
 0x2fc   :  { %v2656_v59 = vpop.eup %2655  ;;  %2661 = vrcp.f32 %v3389_v52  ;;  %v3396_v1 = vadd.f32 1.0, %v2654_v30  ;;  %v3442_v35 = vsel %vm3407_vm7, %v706_v47, %v702_v23  ;;  %vm3465_vm5 = vmor %vm669_vm12, %vm670_vm13 }
 0x2fd   :  { %v2658_v27 = vpop.eup %2657  ;;  %2663 = vpow2.f32 %v2441_v21  ;;  %v710_v25 = vmul.f32 %v2656_v59, %v603_v34  ;;  %v666_v37 = vsub.f32 1.0, %v665_v57  ;;  %vm715_vm10 = vweird.f32 %v2656_v59 }
 0x2fe   :  { %2665 = vrcp.f32 %v3396_v1  ;;  %v3402_v32 = vadd.f32 1.0, %v2658_v27  ;;  %vm716_vm14 = vmor %vm714_vm9, %vm715_vm10  ;;  %v688_v22 = vand.u32 2147483647, %v3396_v1  ;;  %vm684_vm6 = vweird.f32 %v3396_v1 }
 0x2ff   :  { %v711_v38 = vsub.f32 1.0, %v710_v25  ;;  %v667_v49 = vmul.f32 %v3387_v50, %v666_v37 }
 0x300   :  { %2667 = vrcp.f32 %v3402_v32  ;;  %vm3475_vm7 = vcmp.eq.f32.partialorder %v688_v22, 8.507059e+37  ;;  %vm654_vm8 = vweird.f32 %v3402_v32 }
 0x301   :  { %v2660_v21 = vpop.eup %2659  ;;  %v712_v19 = vmul.f32 %v2656_v59, %v711_v38  ;;  %v721_v38 = vor.u32 1.1754944e-38, %v720_v39  ;;  %v668_v31 = vadd.f32 %v3387_v50, %v667_v49  ;;  %v690_v49 = vand.u32 2147483648, %v3396_v1 }
 0x302   :  { %v3419_v57 = vpop.eup %2661  ;;  %v3421_v5 = vadd.f32 1.0, %v2660_v21 }
 0x303   :  { %v2664_v25 = vpop.eup %2663  ;;  %v713_v37 = vadd.f32 %v2656_v59, %v712_v19  ;;  %v620_v43 = vmul.f32 %v3419_v57, %v3389_v52  ;;  %v672_v27 = vsel %vm3465_vm5, %v3387_v50, %v668_v31  ;;  %v691_v53 = vor.u32 1.1754944e-38, %v690_v49 }
 0x304   :  { %v2666_v55 = vpop.eup %2665  ;;  %2669 = vrcp.f32 %v3421_v5  ;;  %v3434_v21 = vadd.f32 1.0, %v2664_v25  ;;  %vm639_vm10 = vweird.f32 %v3421_v5  ;;  %v643_v49 = vand.u32 2147483647, %v3421_v5 }
 0x305   :  { %v717_v39 = vsel %vm716_vm14, %v2656_v59, %v713_v37  ;;  %v680_v19 = vmul.f32 %v2666_v55, %v3396_v1  ;;  %v676_v37 = vor.u32 1.1754944e-38, %v675_v56  ;;  %vm685_vm9 = vweird.f32 %v2666_v55 }
 0x306   :  { %v3449_v25 = vpop.eup %2667  ;;  %2671 = vrcp.f32 %v3434_v21  ;;  %v3454_v34 = vsel %vm3426_vm11, %v721_v38, %v717_v39  ;;  %v660_v56 = vand.u32 2147483648, %v3402_v32  ;;  %v621_v50 = vsub.f32 1.0, %v620_v43  ;;  %vm686_vm11 = vmor %vm684_vm6, %vm685_vm9 }
 0x307   :  { %v2570_v59 = vpack.i.bf16 %v3442_v35, %v3454_v34  ;;  %v681_v48 = vsub.f32 1.0, %v680_v19  ;;  %v650_v23 = vmul.f32 %v3449_v25, %v3402_v32  ;;  %v658_v19 = vand.u32 2147483647, %v3402_v32 }
 0x308   :  { %v3486_v31 = vsel %vm3444_vm15, %v676_v37, %v672_v27  ;;  %vm655_vm12 = vweird.f32 %v3449_v25  ;;  %v622_v43 = vmul.f32 %v3419_v57, %v621_v50  ;;  %v613_v1 = vand.u32 2147483647, %v3434_v21 }
 0x309   :  { %2571 = vrot.lane.b32.xlu0 %v2570_v59, %s3014_s11  ;;  %v682_v20 = vmul.f32 %v2666_v55, %v681_v48  ;;  %v651_v39 = vsub.f32 1.0, %v650_v23  ;;  %v645_v23 = vand.u32 2147483648, %v3421_v5  ;;  %vm625_vm14 = vweird.f32 %v3419_v57  ;;  %vm3506_vm15 = vmor %vm654_vm8, %vm655_vm12 }
 0x30a   :  { %v2670_v54 = vpop.eup %2669  ;;  %v623_v50 = vadd.f32 %v3419_v57, %v622_v43  ;;  %v615_v38 = vand.u32 2147483648, %v3434_v21  ;;  %vm624_vm5 = vweird.f32 %v3389_v52  ;;  %vm644_vm9 = vcmp.eq.f32.partialorder %v643_v49, 8.507059e+37 }
 0x30b   :  { %v683_v22 = vadd.f32 %v2666_v55, %v682_v20  ;;  %v635_v47 = vmul.f32 %v2670_v54, %v3421_v5  ;;  %v652_v59 = vmul.f32 %v3449_v25, %v651_v39  ;;  %vm640_vm13 = vweird.f32 %v2670_v54 }
 0x30c   :  { %v2672_v48 = vpop.eup %2671  ;;  %vm641_vm8 = vmor %vm639_vm10, %vm640_vm13  ;;  %vm609_vm12 = vweird.f32 %v3434_v21  ;;  %vm614_vm10 = vcmp.eq.f32.partialorder %v613_v1, 8.507059e+37 }
 0x30d   :  { %v687_v30 = vsel %vm686_vm11, %v2666_v55, %v683_v22  ;;  %v636_v27 = vsub.f32 1.0, %v635_v47  ;;  %v653_v37 = vadd.f32 %v3449_v25, %v652_v59  ;;  %v605_v20 = vmul.f32 %v2672_v48, %v3434_v21 }
 0x30e   :  { %v692_v39 = vsel %vm3475_vm7, %v691_v53, %v687_v30  ;;  %v628_v53 = vand.u32 2147483647, %v3389_v52  ;;  %v630_v22 = vand.u32 2147483648, %v3389_v52  ;;  %vm610_vm6 = vweird.f32 %v2672_v48  ;;  %vm3520_vm7 = vmor %vm624_vm5, %vm625_vm14 }
 0x30f   :  { %v2575_v45 = vpack.i.bf16 %v3486_v31, %v692_v39  ;;  %v637_v44 = vmul.f32 %v2670_v54, %v636_v27  ;;  %v606_v36 = vsub.f32 1.0, %v605_v20  ;;  %v657_v59 = vsel %vm3506_vm15, %v3449_v25, %v653_v37  ;;  %vm611_vm14 = vmor %vm609_vm12, %vm610_vm6 }
 0x310   :  { %v646_v52 = vor.u32 1.1754944e-38, %v645_v23  ;;  %vm659_vm11 = vcmp.eq.f32.partialorder %v658_v19, 8.507059e+37  ;;  %v616_v37 = vor.u32 1.1754944e-38, %v615_v38  ;;  %v631_v20 = vor.u32 1.1754944e-38, %v630_v22 }
 0x311   :  { %2576 = vrot.lane.b32.xlu1 %v2575_v45, %s3014_s11  ;;  %v638_v47 = vadd.f32 %v2670_v54, %v637_v44  ;;  %v607_v32 = vmul.f32 %v2672_v48, %v606_v36  ;;  %v661_v44 = vor.u32 1.1754944e-38, %v660_v56  ;;  %v627_v36 = vsel %vm3520_vm7, %v3419_v57, %v623_v50 }
 0x312   :  { %vm629_vm13 = vcmp.eq.f32.partialorder %v628_v53, 8.507059e+37  ;;  %v731_v57 = vmul.f32 %v3454_v34, %v3346_v17  ;;  %v728_v17 = vmul.f32 %v3486_v31, %v3330_v11 }
 0x313   :  { %v642_v45 = vsel %vm641_vm8, %v2670_v54, %v638_v47  ;;  %v608_v30 = vadd.f32 %v2672_v48, %v607_v32  ;;  %v662_v27 = vsel %vm659_vm11, %v661_v44, %v657_v59  ;;  %v632_v19 = vsel %vm629_vm13, %v631_v20, %v627_v36  ;;  %v913_v20 = vld [vmem:[%s4315_s12] sm:$0xf] }
 0x314   :  { %v647_v25 = vsel %vm644_vm9, %v646_v52, %v642_v45  ;;  %v729_v59 = vmul.f32 %v692_v39, %v3334_v13  ;;  %v725_v36 = vmul.f32 %v632_v19, %v3324_v8  ;;  %v1043_v8 = vld [vmem:[#allocation10 + $0x28] sm:$0xff] }
 0x315   :  { %v2580_v55 = vpack.i.bf16 %v647_v25, %v662_v27  ;;  %v612_v5 = vsel %vm611_vm14, %v2672_v48, %v608_v30  ;;  %v730_v48 = vmul.f32 %v3442_v35, %v3340_v15  ;;  %v727_v35 = vmul.f32 %v662_v27, %v3328_v10  ;;  %v3554_v10 = vld [vmem:[%s4370_s17] sm:$0xff] }
 0x316   :  { %v617_v49 = vsel %vm614_vm10, %v616_v37, %v612_v5  ;;  %v726_v44 = vmul.f32 %v647_v25, %v3326_v9  ;;  %v1045_v25 = vld [vmem:[#allocation10 + $0x38] sm:$0xff]  ;;  %v1044_v27 = vld [vmem:[#allocation10 + $0x30] sm:$0xff]  ;;  %v1042_v37 = vld [vmem:[#allocation10 + $0x20] sm:$0xff]  ;;  %v932_v5 = vperm.slane %v913_v20, 2 }
 0x317   :  { %2581 = vrot.lane.b32.xlu2 %v2580_v55, %s3014_s11  ;;  %v2585_v54 = vpack.i.bf16 %v617_v49, %v632_v19  ;;  %v724_v31 = vmul.f32 %v617_v49, %v3322_v7  ;;  %v3562_v7 = vld [vmem:[%s4370_s17 + $0x8] sm:$0xff]  ;;  %v3572_v55 = vld [vmem:[%s4370_s17 + $0x10] sm:$0xff]  ;;  %v941_v19 = vperm.slane %v913_v20, 3 }
 0x318   :  { %v933_v49 = vmul.f32 %v932_v5, %v3384_v46 }
 0x319   :  { %2586 = vrot.lane.b32.xlu0 %v2585_v54, %s3014_s11  ;;  %v3580_v54 = vld [vmem:[%s4370_s17 + $0x18] sm:$0xff] }
 0x371   :  { %v2582_v38 = vpop.permute.xlu2 %2581 }
 0x372   :  { %v2583_v32 = vunpack.i.l.bf16 %v2582_v38  ;;  %v2584_v34 = vunpack.i.h.bf16 %v2582_v38 }
 0x374   :  { %v767_v52 = vsel %vm331_vm1, %v727_v35, %v2583_v32  ;;  %v766_v30 = vsel %vm331_vm1, %v726_v44, %v2584_v34 }
 0x37b   :  { %v2572_v21 = vpop.permute.xlu0 %2571 }
 0x37c   :  { %v2574_v56 = vunpack.i.h.bf16 %v2572_v21  ;;  %v2573_v23 = vunpack.i.l.bf16 %v2572_v21  ;;  %v942_v21 = vadd.f32 %v941_v19, %v933_v49 }
 0x37e   :  { %v771_v50 = vsel %vm331_vm1, %v731_v57, %v2573_v23  ;;  %v770_v1 = vsel %vm331_vm1, %v730_v48, %v2574_v56  ;;  %v934_v56 = vmul.f32 %v932_v5, %v3366_v61  ;;  %v974_v23 = vmax.f32 %v942_v21, 0.0 }
 0x37f   :  { %792 = vmatpush.msrb.mxu2 %v771_v50  ;;  %v935_v48 = vmul.f32 %v932_v5, %v3382_v40  ;;  %v936_v61 = vmul.f32 %v932_v5, %v3370_v3  ;;  %v938_v3 = vmul.f32 %v932_v5, %v3368_v63  ;;  %v940_v63 = vmul.f32 %v932_v5, %v3359_v42 }
 0x380   :  { %v943_v57 = vadd.f32 %v941_v19, %v934_v56  ;;  %v3586_v50 = vadd.f32 %v974_v23, %v3274_v51 }
 0x381   :  { %793 = vmatpush.msrb.mxu2 %v770_v1  ;;  %v944_v1 = vadd.f32 %v941_v19, %v935_v48  ;;  %v949_v35 = vadd.f32 %v941_v19, %v940_v63 }
 0x382   :  { %v975_v46 = vmax.f32 %v943_v57, 0.0 }
 0x383   :  { %v2577_v53 = vpop.permute.xlu1 %2576 }
 0x384   :  { %v2579_v22 = vunpack.i.h.bf16 %v2577_v53  ;;  %v2578_v47 = vunpack.i.l.bf16 %v2577_v53  ;;  %v3592_v38 = vadd.f32 %v975_v46, %v3294_v58  ;;  %v976_v53 = vmax.f32 %v944_v1, 0.0 }
 0x386   :  { %v769_v43 = vsel %vm331_vm1, %v729_v59, %v2578_v47  ;;  %v768_v15 = vsel %vm331_vm1, %v728_v17, %v2579_v22  ;;  %v945_v22 = vadd.f32 %v941_v19, %v936_v61  ;;  %v3598_v51 = vadd.f32 %v976_v53, %v3298_v60 }
 0x387   :  { %794 = vmatpush.msrb.mxu2 %v769_v43  ;;  %v937_v47 = vmul.f32 %v932_v5, %v3357_v41  ;;  %v947_v43 = vadd.f32 %v941_v19, %v938_v3  ;;  %v939_v41 = vmul.f32 %v932_v5, %v3354_v33 }
 0x388   :  { %v977_v40 = vmax.f32 %v945_v22, 0.0 }
 0x389   :  { %795 = vmatpush.msrb.mxu2 %v768_v15  ;;  %v946_v59 = vadd.f32 %v941_v19, %v937_v47  ;;  %v979_v17 = vmax.f32 %v947_v43, 0.0  ;;  %v948_v34 = vadd.f32 %v941_v19, %v939_v41 }
 0x38a   :  { %v3604_v58 = vadd.f32 %v977_v40, %v3302_v62 }
 0x38b   :  { %v2587_v45 = vpop.permute.xlu0 %2586  ;;  %796 = vmatpush.msrb.mxu2 %v767_v52  ;;  %v978_v32 = vmax.f32 %v946_v59, 0.0  ;;  %v3616_v62 = vadd.f32 %v979_v17, %v3310_v2  ;;  %v980_v15 = vmax.f32 %v948_v34, 0.0  ;;  %v981_v52 = vmax.f32 %v949_v35, 0.0 }
 0x38c   :  { %v2589_v13 = vunpack.i.h.bf16 %v2587_v45  ;;  %v2588_v39 = vunpack.i.l.bf16 %v2587_v45 }
 0x38d   :  { %797 = vmatpush.msrb.mxu2 %v766_v30  ;;  %v3610_v60 = vadd.f32 %v978_v32, %v3306_v0  ;;  %v3622_v0 = vadd.f32 %v980_v15, %v3314_v4  ;;  %v3627_v33 = vadd.f32 %v981_v52, %v3318_v6  ;;  %v914_v30 = vperm.slane %v913_v20, 0 }
 0x38e   :  { %v765_v11 = vsel %vm331_vm1, %v725_v36, %v2588_v39  ;;  %v764_v9 = vsel %vm331_vm1, %v724_v31, %v2589_v13  ;;  %v923_v36 = vperm.slane %v913_v20, 1 }
 0x38f   :  { %798 = vmatpush.msrb.mxu2 %v765_v11 }
 0x391   :  { %799 = vmatpush.msrb.mxu2 %v764_v9 }
 0x392   :  { %2449 = vmatmul.msk.f32.vlgmr.msrb.gmra.mxu2 %vm466_vm4, %v3554_v10 }
 0x393   :  { %1087 = vmatpush.msra.mxu2 %v1045_v25 }
 0x395   :  { %1088 = vmatpush.msra.mxu2 %v1044_v27 }
 0x397   :  { %1089 = vmatpush.msra.mxu2 %v1043_v8 }
 0x399   :  { %1090 = vmatpush.msra.mxu2 %v1042_v37 }
 0x39a   :  { %2450 = vmatmul.msk.f32.gmra.mxu2 %vm466_vm4, %v3562_v7 }
 0x3a2   :  { %2451 = vmatmul.msk.f32.gmra.mxu2 %vm466_vm4, %v3572_v55 }
 0x3aa   :  { %2452 = vmatmul.msk.f32.gmra.mxu2 %vm466_vm4, %v3580_v54 }
 0x3b2   :  { %2461 = vmatmul.msk.f32.vlgmr.msra.gmra.mxu2 %vm331_vm1, %v3586_v50 }
 0x3ba   :  { %2462 = vmatmul.msk.f32.gmra.mxu2 %vm331_vm1, %v3592_v38 }
 0x3c2   :  { %2463 = vmatmul.msk.f32.gmra.mxu2 %vm331_vm1, %v3598_v51 }
 0x3ca   :  { %2464 = vmatmul.msk.f32.gmra.mxu2 %vm331_vm1, %v3604_v58 }
 0x3d2   :  { %2465 = vmatmul.msk.f32.gmra.mxu2 %vm331_vm1, %v3610_v60 }
 0x3da   :  { %2466 = vmatmul.msk.f32.gmra.mxu2 %vm331_vm1, %v3616_v62 }
 0x3e2   :  { %2467 = vmatmul.msk.f32.gmra.mxu2 %vm331_vm1, %v3622_v0 }
 0x3ea   :  { %2468 = vmatmul.msk.f32.gmra.mxu2 %vm331_vm1, %v3627_v33 }
 0x415   :  { %v801_v2 = vpop.f32.mrf.mxu2 }
 0x416   :  { %v813_v44 = vadd.f32 1e-06, %v801_v2 }
 0x418   :  { %821 = vrot.lane.b32.xlu1 %v813_v44, %s3013_s28 }
 0x41d   :  { %v804_v45 = vpop.f32.mrf.mxu2 }
 0x41e   :  { %v814_v42 = vadd.f32 1e-06, %v804_v45 }
 0x420   :  { %823 = vrot.lane.b32.xlu2 %v814_v42, %s3013_s28 }
 0x425   :  { %v3633_v4 = vpop.f32.mrf.mxu2 }
 0x426   :  { %v815_v13 = vadd.f32 1e-06, %v3633_v4 }
 0x428   :  { %825 = vrot.lane.b32.xlu0 %v815_v13, %s3013_s28 }
 0x42d   :  { %v3637_v39 = vpop.f32.mrf.mxu2 }
 0x42e   :  { %v816_v6 = vadd.f32 1e-06, %v3637_v39 }
 0x430   :  { %827 = vrot.lane.b32.xlu1 %v816_v6, %s3013_s28  ;;  %916 = vrot.lane.b32.xlu0 %v914_v30, %s3013_s28 }
 0x438   :  { %925 = vrot.lane.b32.xlu1 %v923_v36, %s3013_s28 }
 0x47a   :  { %v824_v11 = vpop.permute.xlu2 %823 }
 0x47b   :  { %2673 = vrcp.f32 %v824_v11  ;;  %v859_v1 = vand.u32 2147483648, %v824_v11  ;;  %vm853_vm9 = vweird.f32 %v824_v11  ;;  %v857_v22 = vand.u32 2147483647, %v824_v11 }
 0x47d   :  { %v860_v40 = vor.u32 1.1754944e-38, %v859_v1  ;;  %vm858_vm12 = vcmp.eq.f32.partialorder %v857_v22, 8.507059e+37 }
 0x481   :  { %v2674_v9 = vpop.eup %2673 }
 0x482   :  { %v849_v25 = vmul.f32 %v2674_v9, %v824_v11  ;;  %vm854_vm8 = vweird.f32 %v2674_v9 }
 0x483   :  { %vm855_vm11 = vmor %vm853_vm9, %vm854_vm8 }
 0x484   :  { %v850_v8 = vsub.f32 1.0, %v849_v25 }
 0x486   :  { %v851_v19 = vmul.f32 %v2674_v9, %v850_v8 }
 0x488   :  { %v852_v48 = vadd.f32 %v2674_v9, %v851_v19 }
 0x48a   :  { %v822_v31 = vpop.permute.xlu1 %821  ;;  %v856_v47 = vsel %vm855_vm11, %v2674_v9, %v852_v48 }
 0x48b   :  { %2675 = vrcp.f32 %v822_v31  ;;  %v844_v49 = vand.u32 2147483648, %v822_v31  ;;  %v842_v56 = vand.u32 2147483647, %v822_v31  ;;  %vm838_vm5 = vweird.f32 %v822_v31 }
 0x48c   :  { %v861_v32 = vsel %vm858_vm12, %v860_v40, %v856_v47 }
 0x48d   :  { %v845_v20 = vor.u32 1.1754944e-38, %v844_v49  ;;  %vm843_vm7 = vcmp.eq.f32.partialorder %v842_v56, 8.507059e+37  ;;  %v862_v17 = vmul.f32 %v861_v32, %v804_v45 }
 0x491   :  { %v2676_v27 = vpop.eup %2675 }
 0x492   :  { %v834_v37 = vmul.f32 %v2676_v27, %v822_v31  ;;  %vm839_vm15 = vweird.f32 %v2676_v27 }
 0x493   :  { %vm840_vm6 = vmor %vm838_vm5, %vm839_vm15 }
 0x494   :  { %v835_v5 = vsub.f32 1.0, %v834_v37 }
 0x496   :  { %v836_v21 = vmul.f32 %v2676_v27, %v835_v5 }
 0x498   :  { %v837_v23 = vadd.f32 %v2676_v27, %v836_v21 }
 0x49a   :  { %v826_v57 = vpop.permute.xlu0 %825  ;;  %v841_v46 = vsel %vm840_vm6, %v2676_v27, %v837_v23 }
 0x49b   :  { %2677 = vrcp.f32 %v826_v57  ;;  %v846_v61 = vsel %vm843_vm7, %v845_v20, %v841_v46  ;;  %v874_v34 = vand.u32 2147483648, %v826_v57  ;;  %v872_v63 = vand.u32 2147483647, %v826_v57 }
 0x49c   :  { %v847_v53 = vmul.f32 %v846_v61, %v801_v2  ;;  %vm868_vm10 = vweird.f32 %v826_v57 }
 0x49d   :  { %v875_v2 = vor.u32 1.1754944e-38, %v874_v34  ;;  %vm873_vm15 = vcmp.eq.f32.partialorder %v872_v63, 8.507059e+37 }
 0x49e   :  { %897 = vrot.lane.b32.xlu2 %v847_v53, %s3013_s28 }
 0x4a1   :  { %v2678_v59 = vpop.eup %2677 }
 0x4a2   :  { %v864_v3 = vmul.f32 %v2678_v59, %v826_v57  ;;  %v828_v43 = vpop.permute.xlu1 %827  ;;  %vm869_vm14 = vweird.f32 %v2678_v59  ;;  %v917_v5 = vpop.permute.xlu0 %916 }
 0x4a3   :  { %2679 = vrcp.f32 %v828_v43  ;;  %vm870_vm13 = vmor %vm868_vm10, %vm869_vm14  ;;  %vm883_vm5 = vweird.f32 %v828_v43  ;;  %v889_v13 = vand.u32 2147483648, %v828_v43  ;;  %v887_v36 = vand.u32 2147483647, %v828_v43 }
 0x4a4   :  { %v865_v41 = vsub.f32 1.0, %v864_v3 }
 0x4a5   :  { %v890_v31 = vor.u32 1.1754944e-38, %v889_v13  ;;  %vm888_vm8 = vcmp.eq.f32.partialorder %v887_v36, 8.507059e+37 }
 0x4a6   :  { %v866_v15 = vmul.f32 %v2678_v59, %v865_v41  ;;  %899 = vrot.lane.b32.xlu2 %v862_v17, %s3013_s28  ;;  %v2453_v41 = vld [vmem:[%s4311_s8 + $0x20] sm:$0xff] }
 0x4a8   :  { %v867_v35 = vadd.f32 %v2678_v59, %v866_v15 }
 0x4a9   :  { %v2680_v52 = vpop.eup %2679 }
 0x4aa   :  { %v879_v44 = vmul.f32 %v2680_v52, %v828_v43  ;;  %v871_v42 = vsel %vm870_vm13, %v2678_v59, %v867_v35  ;;  %vm884_vm6 = vweird.f32 %v2680_v52 }
 0x4ab   :  { %v876_v6 = vsel %vm873_vm15, %v875_v2, %v871_v42  ;;  %vm885_vm7 = vmor %vm883_vm5, %vm884_vm6 }
 0x4ac   :  { %v880_v30 = vsub.f32 1.0, %v879_v44  ;;  %v877_v45 = vmul.f32 %v876_v6, %v3633_v4  ;;  %v926_v4 = vpop.permute.xlu1 %925 }
 0x4ae   :  { %v881_v11 = vmul.f32 %v2680_v52, %v880_v30  ;;  %901 = vrot.lane.b32.xlu0 %v877_v45, %s3013_s28 }
 0x4b0   :  { %v882_v9 = vadd.f32 %v2680_v52, %v881_v11 }
 0x4b2   :  { %v886_v25 = vsel %vm885_vm7, %v2680_v52, %v882_v9  ;;  %v3717_v9 = vld [vmem:[#allocation2] sm:$0xff] }
 0x4b3   :  { %v891_v27 = vsel %vm888_vm8, %v890_v31, %v886_v25  ;;  %4373 = vst [vmem:[#allocation31_spill] sm:$0xff] %v3717_v9  ;;  %v3721_v25 = vld [vmem:[#allocation2 + $0x8] sm:$0xff] }
 0x4b4   :  { %v892_v8 = vmul.f32 %v891_v27, %v3637_v39  ;;  %v2456_v39 = vld [vmem:[%s4311_s8 + $0x38] sm:$0xff]  ;;  %4374 = vst [vmem:[#allocation32_spill] sm:$0xff] %v3721_v25  ;;  %v4375_v27 = vld [vmem:[#allocation24_spill] sm:$0xff] }
 0x4b5   :  { %1024 = vmatpush.msrb.mxu1 %v2456_v39  ;;  %v1092_v39 = vpop.f32.mrf.mxu2 }
 0x4b6   :  { %903 = vrot.lane.b32.xlu1 %v892_v8, %s3013_s28  ;;  %v4376_v8 = vld [vmem:[#allocation25_spill] sm:$0xff] }
 0x4f8   :  { %v898_v37 = vpop.permute.xlu2 %897 }
 0x4f9   :  { %v909_v49 = vadd.f32 %v898_v37, %v3207_v26  ;;  %v2455_v26 = vld [vmem:[%s4311_s8 + $0x30] sm:$0xff] }
 0x4fa   :  { %1025 = vmatpush.msrb.mxu1 %v2455_v26  ;;  %v4377_v37 = vld [vmem:[#allocation26_spill] sm:$0xff]  ;;  %v3769_v26 = vpop.f32.mrf.mxu2 }
 0x4fb   :  { %v919_v19 = vmul.f32 %v917_v5, %v909_v49  ;;  %v4379_v49 = vld [vmem:[#allocation28_spill] sm:$0xff] }
 0x4fd   :  { %v928_v21 = vadd.f32 %v926_v4, %v919_v19 }
 0x4ff   :  { %v950_v56 = vmax.f32 %v928_v21, 0.0 }
 0x500   :  { %v900_v23 = vpop.permute.xlu2 %899 }
 0x501   :  { %v910_v20 = vadd.f32 %v900_v23, %v3203_v24  ;;  %958 = vrot.lane.b32.xlu2 %v950_v56, %s3014_s11  ;;  %v2454_v24 = vld [vmem:[%s4311_s8 + $0x28] sm:$0xff] }
 0x502   :  { %1026 = vmatpush.msrb.mxu1 %v2454_v24  ;;  %v1098_v24 = vpop.f32.mrf.mxu2 }
 0x503   :  { %v920_v57 = vmul.f32 %v917_v5, %v910_v20 }
 0x504   :  { %1027 = vmatpush.msrb.mxu1 %v2453_v41 }
 0x505   :  { %v929_v46 = vadd.f32 %v926_v4, %v920_v57 }
 0x507   :  { %v951_v48 = vmax.f32 %v929_v46, 0.0 }
 0x509   :  { %960 = vrot.lane.b32.xlu0 %v951_v48, %s3014_s11 }
 0x520   :  { %v902_v1 = vpop.permute.xlu0 %901 }
 0x521   :  { %v911_v61 = vadd.f32 %v902_v1, %v3215_v29  ;;  %v1101_v1 = vpop.f32.mrf.mxu2 }
 0x523   :  { %v921_v53 = vmul.f32 %v917_v5, %v911_v61 }
 0x525   :  { %v930_v22 = vadd.f32 %v926_v4, %v921_v53 }
 0x527   :  { %v952_v47 = vmax.f32 %v930_v22, 0.0 }
 0x528   :  { %v904_v40 = vpop.permute.xlu1 %903 }
 0x529   :  { %v912_v59 = vadd.f32 %v904_v40, %v3211_v28  ;;  %962 = vrot.lane.b32.xlu1 %v952_v47, %s3014_s11  ;;  %v1104_v61 = vpop.f32.mrf.mxu2  ;;  %v3771_v47 = vld [vmem:[#allocation11 + $0x1] ss:$0 sm:$0xff] }
 0x52b   :  { %v922_v32 = vmul.f32 %v917_v5, %v912_v59  ;;  %v4378_v5 = vld [vmem:[#allocation27_spill] sm:$0xff]  ;;  %v1102_v59 = vadd.f32 %v3771_v47, %v1101_v1 }
 0x52d   :  { %v931_v3 = vadd.f32 %v926_v4, %v922_v32  ;;  %v4380_v4 = vld [vmem:[#allocation29_spill] sm:$0xff] }
 0x52f   :  { %v953_v43 = vmax.f32 %v931_v3, 0.0 }
 0x531   :  { %964 = vrot.lane.b32.xlu2 %v953_v43, %s3014_s11  ;;  %v1107_v53 = vpop.f32.mrf.mxu2 }
 0x539   :  { %v1110_v40 = vpop.f32.mrf.mxu2 }
 0x53a   :  { %v1111_v3 = vadd.f32 %v3771_v47, %v1110_v40 }
 0x55b   :  { %v959_v17 = vpop.permute.xlu2 %958 }
 0x55c   :  { %v3670_v29 = vadd.f32 %v959_v17, %v3183_v12 }
 0x55e   :  { %2457 = vmatmul.msk.f32.vlgmr.msrb.gmra.mxu1 %vm331_vm1, %v3670_v29 }
 0x57b   :  { %v961_v28 = vpop.permute.xlu0 %960 }
 0x57c   :  { %v3675_v34 = vadd.f32 %v961_v28, %v3187_v14  ;;  %v2635_v14 = vld [vmem:[#allocation8 + $0x1] ss:$0 sm:$0xff] }
 0x57e   :  { %2458 = vmatmul.msk.f32.gmra.mxu1 %vm331_vm1, %v3675_v34 }
 0x58b   :  { %v965_v35 = vpop.permute.xlu2 %964 }
 0x58c   :  { %v3685_v12 = vadd.f32 %v965_v35, %v3195_v18  ;;  %v1108_v35 = vadd.f32 %v3771_v47, %v1107_v53 }
 0x58e   :  { %4371 = vst [vmem:[#allocation30_spill] sm:$0xff] %v3685_v12 }
 0x59b   :  { %v963_v15 = vpop.permute.xlu1 %962 }
 0x59c   :  { %v3680_v63 = vadd.f32 %v963_v15, %v3191_v16 }
 0x59e   :  { %2459 = vmatmul.msk.f32.gmra.mxu1 %vm331_vm1, %v3680_v63 }
 0x5a6   :  { %2460 = vmatmul.msk.f32.gmra.mxu1 %vm331_vm1, %v3685_v12 }
 0x5db   :  { %v1029_v52 = vpop.f32.mrf.mxu1 }
 0x5dc   :  { %v3701_v6 = vadd.f32 %v2635_v14, %v1029_v52 }
 0x5fb   :  { %v1032_v2 = vpop.f32.mrf.mxu1 }
 0x5fc   :  { %v3689_v44 = vadd.f32 %v2635_v14, %v1032_v2 }
 0x5fe   :  { %1122 = vrot.lane.b32.xlu2 %v3689_v44, %s3013_s28 }
 0x61b   :  { %v1035_v16 = vpop.f32.mrf.mxu1 }
 0x61c   :  { %v3693_v42 = vadd.f32 %v2635_v14, %v1035_v16  ;;  %v1099_v16 = vadd.f32 %v3771_v47, %v1098_v24 }
 0x61e   :  { %1124 = vrot.lane.b32.xlu1 %v3693_v42, %s3013_s28 }
 0x623   :  { %v1038_v13 = vpop.f32.mrf.mxu1 }
 0x624   :  { %v3697_v18 = vadd.f32 %v2635_v14, %v1038_v13 }
 0x626   :  { %1126 = vrot.lane.b32.xlu0 %v3697_v18, %s3013_s28 }
 0x62e   :  { %1120 = vrot.lane.b32.xlu0 %v3701_v6, %s3013_s28 }
 0x658   :  { %v1123_v11 = vpop.permute.xlu2 %1122 }
 0x690   :  { %v1125_v36 = vpop.permute.xlu1 %1124 }
 0x698   :  { %v1127_v30 = vpop.permute.xlu0 %1126 }
 0x699   :  { %2470 = vmatpush.msk.msrb.mxu3 %vm3244_vm3, %v1127_v30 }
 0x69b   :  { %2472 = vmatpush.msk.msrb.mxu3 %vm3244_vm3, %v1125_v36 }
 0x69d   :  { %2474 = vmatpush.msk.msrb.mxu3 %vm3244_vm3, %v1123_v11 }
 0x6a0   :  { %v1121_v31 = vpop.permute.xlu0 %1120 }
 0x6a1   :  { %2476 = vmatpush.msk.msrb.mxu3 %vm3244_vm3, %v1121_v31 }
 0x6a3   :  { %1148 = vmatpush.msrb.mxu3 %v3697_v18 }
 0x6a5   :  { %1149 = vmatpush.msrb.mxu3 %v3693_v42 }
 0x6a7   :  { %1150 = vmatpush.msrb.mxu3 %v3689_v44 }
 0x6a9   :  { %1151 = vmatpush.msrb.mxu3 %v3701_v6 }
 0x6aa   :  { %2477 = vmatmul.msk.f32.vlgmr.msrb.gmra.mxu3 %vm466_vm4, %v3717_v9 }
 0x6b2   :  { %2478 = vmatmul.msk.f32.gmra.mxu3 %vm466_vm4, %v3721_v25 }
 0x6ba   :  { %2479 = vmatmul.msk.f32.gmra.mxu3 %vm466_vm4, %v4375_v27  ;;  %v1093_v27 = vadd.f32 %v3771_v47, %v1092_v39 }
 0x6c2   :  { %2480 = vmatmul.msk.f32.gmra.mxu3 %vm466_vm4, %v4376_v8 }
 0x6ca   :  { %2481 = vmatmul.msk.f32.gmra.mxu3 %vm466_vm4, %v4377_v37  ;;  %v1113_v37 = vpop.f32.mrf.mxu2 }
 0x6cb   :  { %v1114_v24 = vadd.f32 %v3771_v47, %v1113_v37 }
 0x6d2   :  { %2482 = vmatmul.msk.f32.gmra.mxu3 %vm466_vm4, %v4378_v5 }
 0x6da   :  { %2483 = vmatmul.msk.f32.gmra.mxu3 %vm466_vm4, %v4379_v49 }
 0x6e2   :  { %2484 = vmatmul.msk.f32.gmra.mxu3 %vm466_vm4, %v4380_v4 }
 0x72d   :  { %v3737_v19 = vpop.f32.mrf.mxu3 }
 0x735   :  { %v3739_v21 = vpop.f32.mrf.mxu3 }
 0x73d   :  { %v3741_v56 = vpop.f32.mrf.mxu3 }
 0x745   :  { %v3743_v23 = vpop.f32.mrf.mxu3 }
 0x74d   :  { %v3745_v20 = vpop.f32.mrf.mxu3 }
 0x755   :  { %v3747_v57 = vpop.f32.mrf.mxu3 }
 0x756   :  { %1195 = vrot.lane.b32.xlu0 %v3747_v57, %s3013_s28 }
 0x75d   :  { %v3751_v46 = vpop.f32.mrf.mxu3 }
 0x75e   :  { %1189 = vrot.lane.b32.xlu0 %v3741_v56, %s3013_s28  ;;  %1197 = vrot.lane.b32.xlu2 %v3751_v46, %s3013_s28 }
 0x765   :  { %v3757_v48 = vpop.f32.mrf.mxu3 }
 0x766   :  { %1191 = vrot.lane.b32.xlu2 %v3743_v23, %s3013_s28  ;;  %1199 = vrot.lane.b32.xlu1 %v3757_v48, %s3013_s28 }
 0x76e   :  { %1185 = vrot.lane.b32.xlu2 %v3737_v19, %s3013_s28  ;;  %1193 = vrot.lane.b32.xlu1 %v3745_v20, %s3013_s28 }
 0x776   :  { %1187 = vrot.lane.b32.xlu1 %v3739_v21, %s3013_s28 }
 0x7b8   :  { %v1198_v22 = vpop.permute.xlu2 %1197 }
 0x7b9   :  { %v3777_v41 = vadd.f32 %v1198_v22, %v1111_v3 }
 0x7bb   :  { %v2491_v28 = vmul.f32 -1.442695, %v3777_v41 }
 0x7c0   :  { %v1192_v32 = vpop.permute.xlu2 %1191 }
 0x7c1   :  { %v3775_v43 = vadd.f32 %v1192_v32, %v1102_v59 }
 0x7c3   :  { %v2488_v17 = vmul.f32 -1.442695, %v3775_v43 }
 0x7c5   :  { %2681 = vpow2.f32 %v2488_v17 }
 0x7c6   :  { %2683 = vpow2.f32 %v2491_v28 }
 0x7c8   :  { %v1196_v15 = vpop.permute.xlu0 %1195  ;;  %v1186_v11 = vpop.permute.xlu2 %1185 }
 0x7c9   :  { %v3782_v14 = vadd.f32 %v1196_v15, %v1108_v35  ;;  %v3795_v49 = vadd.f32 %v1186_v11, %v1093_v27  ;;  %v1105_v35 = vadd.f32 %v3771_v47, %v1104_v61 }
 0x7cb   :  { %v2682_v52 = vpop.eup %2681  ;;  %v2490_v13 = vmul.f32 -1.442695, %v3782_v14  ;;  %v2485_v1 = vmul.f32 -1.442695, %v3795_v49 }
 0x7cc   :  { %v3784_v2 = vadd.f32 1.0, %v2682_v52  ;;  %v2684_v36 = vpop.eup %2683 }
 0x7cd   :  { %v3793_v5 = vadd.f32 1.0, %v2684_v36 }
 0x7ce   :  { %2685 = vrcp.f32 %v3784_v2  ;;  %v1303_v61 = vand.u32 2147483647, %v3784_v2  ;;  %vm1299_vm11 = vweird.f32 %v3784_v2 }
 0x7cf   :  { %2687 = vpow2.f32 %v2490_v13  ;;  %vm1344_vm7 = vweird.f32 %v3793_v5 }
 0x7d0   :  { %v1190_v30 = vpop.permute.xlu0 %1189  ;;  %vm3843_vm10 = vcmp.eq.f32.partialorder %v1303_v61, 8.507059e+37 }
 0x7d1   :  { %v3789_v31 = vadd.f32 %v1190_v30, %v1099_v16 }
 0x7d3   :  { %v2487_v8 = vmul.f32 -1.442695, %v3789_v31 }
 0x7d4   :  { %v3797_v4 = vpop.eup %2685 }
 0x7d5   :  { %2689 = vpow2.f32 %v2487_v8  ;;  %v2688_v39 = vpop.eup %2687  ;;  %v1295_v40 = vmul.f32 %v3797_v4, %v3784_v2  ;;  %vm1300_vm9 = vweird.f32 %v3797_v4 }
 0x7d6   :  { %2691 = vrcp.f32 %v3793_v5  ;;  %v3809_v28 = vadd.f32 1.0, %v2688_v39  ;;  %vm3835_vm14 = vmor %vm1299_vm11, %vm1300_vm9 }
 0x7d7   :  { %2693 = vpow2.f32 %v2485_v1  ;;  %v1296_v15 = vsub.f32 1.0, %v1295_v40  ;;  %v1096_v40 = vadd.f32 %v3771_v47, %v3769_v26  ;;  %v1348_v47 = vand.u32 2147483647, %v3793_v5 }
 0x7d8   :  { %v1200_v53 = vpop.permute.xlu1 %1199 }
 0x7d9   :  { %v3802_v22 = vadd.f32 %v1200_v53, %v1114_v24  ;;  %v1297_v36 = vmul.f32 %v3797_v4, %v1296_v15 }
 0x7db   :  { %v2690_v59 = vpop.eup %2689  ;;  %v2492_v32 = vmul.f32 -1.442695, %v3802_v22  ;;  %v1298_v39 = vadd.f32 %v3797_v4, %v1297_v36 }
 0x7dc   :  { %v1243_v3 = vadd.f32 1.0, %v2690_v59  ;;  %v3807_v17 = vpop.eup %2691 }
 0x7dd   :  { %2695 = vpow2.f32 %v2492_v32  ;;  %v1340_v13 = vmul.f32 %v3807_v17, %v3793_v5  ;;  %v2694_v30 = vpop.eup %2693  ;;  %v1302_v26 = vsel %vm3835_vm14, %v3797_v4, %v1298_v39  ;;  %vm1345_vm5 = vweird.f32 %v3807_v17 }
 0x7de   :  { %2697 = vrcp.f32 %v1243_v3  ;;  %v3822_v53 = vadd.f32 1.0, %v2694_v30  ;;  %vm1284_vm13 = vweird.f32 %v1243_v3  ;;  %vm3873_vm8 = vmor %vm1344_vm7, %vm1345_vm5  ;;  %vm1349_vm14 = vcmp.eq.f32.partialorder %v1348_v47, 8.507059e+37 }
 0x7df   :  { %2699 = vrcp.f32 %v3809_v28  ;;  %v1341_v1 = vsub.f32 1.0, %v1340_v13 }
 0x7e0   :  { %v1194_v52 = vpop.permute.xlu1 %1193 }
 0x7e1   :  { %v3812_v16 = vadd.f32 %v1194_v52, %v1105_v35  ;;  %v1290_v35 = vand.u32 2147483648, %v1243_v3  ;;  %v1305_v52 = vand.u32 2147483648, %v3784_v2  ;;  %v1342_v2 = vmul.f32 %v3807_v17, %v1341_v1 }
 0x7e3   :  { %v2696_v11 = vpop.eup %2695  ;;  %v2489_v27 = vmul.f32 -1.442695, %v3812_v16  ;;  %v1291_v36 = vor.u32 1.1754944e-38, %v1290_v35  ;;  %v1306_v4 = vor.u32 1.1754944e-38, %v1305_v52 }
 0x7e4   :  { %v2698_v8 = vpop.eup %2697  ;;  %v3819_v37 = vadd.f32 1.0, %v2696_v11  ;;  %v1288_v11 = vand.u32 2147483647, %v1243_v3 }
 0x7e5   :  { %2701 = vpow2.f32 %v2489_v27  ;;  %v1280_v24 = vmul.f32 %v2698_v8, %v1243_v3  ;;  %v3829_v32 = vpop.eup %2699  ;;  %vm1285_vm12 = vweird.f32 %v2698_v8  ;;  %v3860_v3 = vsel %vm3843_vm10, %v1306_v4, %v1302_v26 }
 0x7e6   :  { %2703 = vrcp.f32 %v3819_v37  ;;  %vm1286_vm15 = vmor %vm1284_vm13, %vm1285_vm12  ;;  %vm1289_vm6 = vcmp.eq.f32.partialorder %v1288_v11, 8.507059e+37  ;;  %v1365_v11 = vand.u32 2147483648, %v3819_v37  ;;  %vm1359_vm11 = vweird.f32 %v3819_v37 }
 0x7e7   :  { %v1281_v59 = vsub.f32 1.0, %v1280_v24  ;;  %2705 = vrcp.f32 %v3822_v53  ;;  %vm1330_vm13 = vweird.f32 %v3829_v32 }
 0x7e8   :  { %v1188_v15 = vpop.permute.xlu1 %1187 }
 0x7e9   :  { %v3833_v13 = vadd.f32 %v1188_v15, %v1096_v40  ;;  %v1282_v30 = vmul.f32 %v2698_v8, %v1281_v59  ;;  %v1325_v59 = vmul.f32 %v3829_v32, %v3809_v28 }
 0x7eb   :  { %v2702_v27 = vpop.eup %2701  ;;  %v2486_v24 = vmul.f32 -1.442695, %v3833_v13  ;;  %v1283_v40 = vadd.f32 %v2698_v8, %v1282_v30  ;;  %v1343_v30 = vadd.f32 %v3807_v17, %v1342_v2 }
 0x7ec   :  { %v2704_v15 = vpop.eup %2703  ;;  %v3851_v25 = vadd.f32 1.0, %v2702_v27  ;;  %v1326_v27 = vsub.f32 1.0, %v1325_v59 }
 0x7ed   :  { %2707 = vpow2.f32 %v2486_v24  ;;  %v1287_v61 = vsel %vm1286_vm15, %v2698_v8, %v1283_v40  ;;  %v1355_v1 = vmul.f32 %v2704_v15, %v3819_v37  ;;  %v3865_v24 = vpop.eup %2705  ;;  %v1350_v8 = vand.u32 2147483648, %v3793_v5 }
 0x7ee   :  { %2709 = vrcp.f32 %v3851_v25  ;;  %v3856_v39 = vsel %vm1289_vm6, %v1291_v36, %v1287_v61  ;;  %vm1360_vm9 = vweird.f32 %v2704_v15  ;;  %v1363_v40 = vand.u32 2147483647, %v3819_v37 }
 0x7ef   :  { %v2600_v35 = vpack.i.bf16 %v3856_v39, %v3860_v3  ;;  %v1356_v52 = vsub.f32 1.0, %v1355_v1  ;;  %v1347_v59 = vsel %vm3873_vm8, %v3807_v17, %v1343_v30  ;;  %v1327_v61 = vmul.f32 %v3829_v32, %v1326_v27  ;;  %vm1361_vm12 = vmor %vm1359_vm11, %vm1360_vm9 }
 0x7f0   :  { %v1250_v1 = vmul.f32 %v3865_v24, %v3822_v53  ;;  %v1351_v5 = vor.u32 1.1754944e-38, %v1350_v8  ;;  %vm1364_vm10 = vcmp.eq.f32.partialorder %v1363_v40, 8.507059e+37  ;;  %vm1329_vm15 = vweird.f32 %v3809_v28 }
 0x7f1   :  { %2601 = vrot.lane.b32.xlu2 %v2600_v35, %s3014_s11  ;;  %v1357_v2 = vmul.f32 %v2704_v15, %v1356_v52  ;;  %v1366_v52 = vor.u32 1.1754944e-38, %v1365_v11  ;;  %v1335_v8 = vand.u32 2147483648, %v3809_v28  ;;  %v1318_v11 = vand.u32 2147483647, %v3851_v25  ;;  %vm1331_vm6 = vmor %vm1329_vm15, %vm1330_vm13 }
 0x7f2   :  { %v1352_v17 = vsel %vm1349_vm14, %v1351_v5, %v1347_v59  ;;  %v1251_v12 = vsub.f32 1.0, %v1250_v1  ;;  %vm1314_vm7 = vweird.f32 %v3851_v25  ;;  %vm1254_vm14 = vweird.f32 %v3822_v53 }
 0x7f3   :  { %v2708_v36 = vpop.eup %2707  ;;  %v1358_v4 = vadd.f32 %v2704_v15, %v1357_v2  ;;  %v1328_v2 = vadd.f32 %v3829_v32, %v1327_v61  ;;  %v1336_v1 = vor.u32 1.1754944e-38, %v1335_v8  ;;  %vm1319_vm9 = vcmp.eq.f32.partialorder %v1318_v11, 8.507059e+37 }
 0x7f4   :  { %v2710_v35 = vpop.eup %2709  ;;  %v1242_v9 = vadd.f32 1.0, %v2708_v36  ;;  %v1320_v36 = vand.u32 2147483648, %v3851_v25  ;;  %v1252_v59 = vmul.f32 %v3865_v24, %v1251_v12  ;;  %v1260_v12 = vand.u32 2147483648, %v3822_v53 }
 0x7f5   :  { %v1362_v45 = vsel %vm1361_vm12, %v2704_v15, %v1358_v4  ;;  %v1310_v26 = vmul.f32 %v2710_v35, %v3851_v25  ;;  %vm1315_vm5 = vweird.f32 %v2710_v35  ;;  %v1332_v40 = vsel %vm1331_vm6, %v3829_v32, %v1328_v2 }
 0x7f6   :  { %2711 = vrcp.f32 %v1242_v9  ;;  %v1367_v30 = vsel %vm1364_vm10, %v1366_v52, %v1362_v45  ;;  %v1333_v45 = vand.u32 2147483647, %v3809_v28  ;;  %vm1316_vm8 = vmor %vm1314_vm7, %vm1315_vm5  ;;  %v1321_v61 = vor.u32 1.1754944e-38, %v1320_v36 }
 0x7f7   :  { %v2590_v37 = vpack.i.bf16 %v1352_v17, %v1367_v30  ;;  %v1311_v27 = vsub.f32 1.0, %v1310_v26  ;;  %v1253_v28 = vadd.f32 %v3865_v24, %v1252_v59  ;;  %vm1255_vm12 = vweird.f32 %v3865_v24 }
 0x7f8   :  { %vm1334_vm11 = vcmp.eq.f32.partialorder %v1333_v45, 8.507059e+37  ;;  %v1275_v32 = vand.u32 2147483648, %v1242_v9  ;;  %v1273_v36 = vand.u32 2147483647, %v1242_v9  ;;  %vm1256_vm13 = vmor %vm1254_vm14, %vm1255_vm12  ;;  %vm1269_vm15 = vweird.f32 %v1242_v9 }
 0x7f9   :  { %2591 = vrot.lane.b32.xlu0 %v2590_v37, %s3014_s11  ;;  %v1312_v15 = vmul.f32 %v2710_v35, %v1311_v27  ;;  %v1337_v37 = vsel %vm1334_vm11, %v1336_v1, %v1332_v40  ;;  %v1257_v8 = vsel %vm1256_vm13, %v3865_v24, %v1253_v28  ;;  %v1261_v11 = vor.u32 1.1754944e-38, %v1260_v12 }
 0x7fa   :  { %v1276_v45 = vor.u32 1.1754944e-38, %v1275_v32  ;;  %vm1274_vm7 = vcmp.eq.f32.partialorder %v1273_v36, 8.507059e+37  ;;  %v1376_v1 = vmul.f32 %v1367_v30, %v3757_v48  ;;  %v1375_v24 = vmul.f32 %v1352_v17, %v3751_v46 }
 0x7fb   :  { %v1313_v47 = vadd.f32 %v2710_v35, %v1312_v15  ;;  %v1372_v46 = vmul.f32 %v3860_v3, %v3743_v23  ;;  %v1371_v36 = vmul.f32 %v3856_v39, %v3741_v56  ;;  %v1678_v56 = vld [vmem:[#allocation10 + $0x50] sm:$0xff]  ;;  %v1676_v39 = vld [vmem:[#allocation10 + $0x40] sm:$0xff] }
 0x7fc   :  { %v2712_v4 = vpop.eup %2711 }
 0x7fd   :  { %v1317_v5 = vsel %vm1316_vm8, %v2710_v35, %v1313_v47  ;;  %v1265_v52 = vmul.f32 %v2712_v4, %v1242_v9  ;;  %v1258_v35 = vand.u32 2147483647, %v3822_v53  ;;  %vm1270_vm10 = vweird.f32 %v2712_v4 }
 0x7fe   :  { %v1322_v26 = vsel %vm1319_vm9, %v1321_v61, %v1317_v5  ;;  %vm1271_vm5 = vmor %vm1269_vm15, %vm1270_vm10 }
 0x7ff   :  { %v2595_v27 = vpack.i.bf16 %v1322_v26, %v1337_v37  ;;  %v1266_v25 = vsub.f32 1.0, %v1265_v52  ;;  %vm1259_vm6 = vcmp.eq.f32.partialorder %v1258_v35, 8.507059e+37  ;;  %v1373_v35 = vmul.f32 %v1322_v26, %v3745_v20 }
 0x800   :  { %v1262_v40 = vsel %vm1259_vm6, %v1261_v11, %v1257_v8 }
 0x801   :  { %2596 = vrot.lane.b32.xlu1 %v2595_v27, %s3014_s11  ;;  %v1267_v2 = vmul.f32 %v2712_v4, %v1266_v25  ;;  %v1374_v25 = vmul.f32 %v1337_v37, %v3747_v57  ;;  %v1369_v23 = vmul.f32 %v1262_v40, %v3737_v19  ;;  %v2497_v19 = vld [vmem:[%s4315_s12 + $0x4] sm:$0xf] }
 0x803   :  { %v1268_v15 = vadd.f32 %v2712_v4, %v1267_v2 }
 0x805   :  { %v1272_v47 = vsel %vm1271_vm5, %v2712_v4, %v1268_v15 }
 0x806   :  { %v1277_v59 = vsel %vm1274_vm7, %v1276_v45, %v1272_v47  ;;  %v1679_v45 = vld [vmem:[#allocation10 + $0x58] sm:$0xff]  ;;  %v1566_v47 = vperm.slane %v2497_v19, 2 }
 0x807   :  { %v2605_v61 = vpack.i.bf16 %v1262_v40, %v1277_v59  ;;  %v1370_v20 = vmul.f32 %v1277_v59, %v3739_v21  ;;  %v1677_v21 = vld [vmem:[#allocation10 + $0x48] sm:$0xff]  ;;  %v1575_v40 = vperm.slane %v2497_v19, 3 }
 0x809   :  { %2606 = vrot.lane.b32.xlu0 %v2605_v61, %s3014_s11 }
 0x84b   :  { %v2602_v4 = vpop.permute.xlu2 %2601 }
 0x84c   :  { %v2603_v2 = vunpack.i.l.bf16 %v2602_v4  ;;  %v2604_v17 = vunpack.i.h.bf16 %v2602_v4 }
 0x84e   :  { %v1412_v57 = vsel %vm331_vm1, %v1372_v46, %v2603_v2  ;;  %v1411_v15 = vsel %vm331_vm1, %v1371_v36, %v2604_v17  ;;  %v1548_v36 = vperm.slane %v2497_v19, 0 }
 0x86b   :  { %v2592_v53 = vpop.permute.xlu0 %2591 }
 0x86c   :  { %v2594_v5 = vunpack.i.h.bf16 %v2592_v53  ;;  %v2593_v52 = vunpack.i.l.bf16 %v2592_v53  ;;  %v1568_v53 = vmul.f32 %v1566_v47, %v3833_v13  ;;  %v1571_v13 = vmul.f32 %v1566_v47, %v3812_v16 }
 0x86e   :  { %v1416_v9 = vsel %vm331_vm1, %v1376_v1, %v2593_v52  ;;  %v1415_v27 = vsel %vm331_vm1, %v1375_v24, %v2594_v5  ;;  %v1577_v1 = vadd.f32 %v1575_v40, %v1568_v53  ;;  %v1569_v5 = vmul.f32 %v1566_v47, %v3789_v31 }
 0x86f   :  { %1425 = vmatpush.msra.mxu1 %v1416_v9  ;;  %v1580_v4 = vadd.f32 %v1575_v40, %v1571_v13 }
 0x870   :  { %v1609_v52 = vmax.f32 %v1577_v1, 0.0  ;;  %v1578_v24 = vadd.f32 %v1575_v40, %v1569_v5 }
 0x871   :  { %1426 = vmatpush.msra.mxu1 %v1415_v27 }
 0x872   :  { %v1610_v9 = vmax.f32 %v1578_v24, 0.0 }
 0x873   :  { %v2597_v28 = vpop.permute.xlu1 %2596 }
 0x874   :  { %v2599_v12 = vunpack.i.h.bf16 %v2597_v28  ;;  %v2598_v32 = vunpack.i.l.bf16 %v2597_v28  ;;  %v1618_v27 = vadd.f32 %v1610_v9, %v3598_v51  ;;  %v1612_v28 = vmax.f32 %v1580_v4, 0.0 }
 0x875   :  { %v1573_v51 = vmul.f32 %v1566_v47, %v3777_v41 }
 0x876   :  { %v1414_v48 = vsel %vm331_vm1, %v1374_v25, %v2598_v32  ;;  %v1413_v30 = vsel %vm331_vm1, %v1373_v35, %v2599_v12 }
 0x877   :  { %1427 = vmatpush.msra.mxu1 %v1414_v48  ;;  %v1582_v32 = vadd.f32 %v1575_v40, %v1573_v51 }
 0x879   :  { %1428 = vmatpush.msra.mxu1 %v1413_v30  ;;  %v1614_v16 = vmax.f32 %v1582_v32, 0.0 }
 0x87b   :  { %v2607_v37 = vpop.permute.xlu0 %2606  ;;  %1429 = vmatpush.msra.mxu1 %v1412_v57  ;;  %v1557_v57 = vperm.slane %v2497_v19, 1 }
 0x87c   :  { %v2609_v26 = vunpack.i.h.bf16 %v2607_v37  ;;  %v2608_v8 = vunpack.i.l.bf16 %v2607_v37 }
 0x87d   :  { %1430 = vmatpush.msra.mxu1 %v1411_v15 }
 0x87e   :  { %v1410_v3 = vsel %vm331_vm1, %v1370_v20, %v2608_v8  ;;  %v1409_v11 = vsel %vm331_vm1, %v1369_v23, %v2609_v26 }
 0x87f   :  { %1431 = vmatpush.msra.mxu1 %v1410_v3 }
 0x881   :  { %1432 = vmatpush.msra.mxu1 %v1409_v11 }
 0x882   :  { %2493 = vmatmul.msk.f32.vlgmr.msra.gmra.mxu1 %vm466_vm4, %v3554_v10  ;;  %v1567_v10 = vmul.f32 %v1566_v47, %v3795_v49  ;;  %v1570_v49 = vmul.f32 %v1566_v47, %v3775_v43  ;;  %v1620_v43 = vadd.f32 %v1612_v28, %v3610_v60 }
 0x883   :  { %1721 = vmatpush.msrb.mxu1 %v1679_v45 }
 0x884   :  { %v1576_v59 = vadd.f32 %v1575_v40, %v1567_v10 }
 0x885   :  { %1722 = vmatpush.msrb.mxu1 %v1678_v56 }
 0x886   :  { %v1608_v61 = vmax.f32 %v1576_v59, 0.0 }
 0x887   :  { %1723 = vmatpush.msrb.mxu1 %v1677_v21 }
 0x889   :  { %1724 = vmatpush.msrb.mxu1 %v1676_v39 }
 0x88a   :  { %2494 = vmatmul.msk.f32.gmra.mxu1 %vm466_vm4, %v3562_v7  ;;  %v1616_v7 = vadd.f32 %v1608_v61, %v3586_v50 }
 0x892   :  { %2495 = vmatmul.msk.f32.gmra.mxu1 %vm466_vm4, %v3572_v55  ;;  %v1617_v55 = vadd.f32 %v1609_v52, %v3592_v38  ;;  %v1572_v38 = vmul.f32 %v1566_v47, %v3782_v14  ;;  %v1622_v14 = vadd.f32 %v1614_v16, %v3622_v0 }
 0x894   :  { %v1581_v25 = vadd.f32 %v1575_v40, %v1572_v38 }
 0x896   :  { %v1613_v12 = vmax.f32 %v1581_v25, 0.0 }
 0x898   :  { %v1621_v35 = vadd.f32 %v1613_v12, %v3616_v62 }
 0x89a   :  { %2496 = vmatmul.msk.f32.gmra.mxu1 %vm466_vm4, %v3580_v54  ;;  %v1579_v54 = vadd.f32 %v1575_v40, %v1570_v49 }
 0x89c   :  { %v1611_v50 = vmax.f32 %v1579_v54, 0.0 }
 0x89e   :  { %v1619_v31 = vadd.f32 %v1611_v50, %v3604_v58  ;;  %v1574_v58 = vmul.f32 %v1566_v47, %v3802_v22 }
 0x8a0   :  { %v1583_v2 = vadd.f32 %v1575_v40, %v1574_v58 }
 0x8a2   :  { %2506 = vmatmul.msk.f32.vlgmr.msrb.gmra.mxu1 %vm331_vm1, %v1616_v7  ;;  %v1615_v48 = vmax.f32 %v1583_v2, 0.0 }
 0x8a4   :  { %v1623_v60 = vadd.f32 %v1615_v48, %v3627_v33 }
 0x8aa   :  { %2507 = vmatmul.msk.f32.gmra.mxu1 %vm331_vm1, %v1617_v55 }
 0x8b2   :  { %2508 = vmatmul.msk.f32.gmra.mxu1 %vm331_vm1, %v1618_v27 }
 0x8ba   :  { %2509 = vmatmul.msk.f32.gmra.mxu1 %vm331_vm1, %v1619_v31 }
 0x8c2   :  { %2510 = vmatmul.msk.f32.gmra.mxu1 %vm331_vm1, %v1620_v43 }
 0x8ca   :  { %2511 = vmatmul.msk.f32.gmra.mxu1 %vm331_vm1, %v1621_v35 }
 0x8d2   :  { %2512 = vmatmul.msk.f32.gmra.mxu1 %vm331_vm1, %v1622_v14 }
 0x8da   :  { %2513 = vmatmul.msk.f32.gmra.mxu1 %vm331_vm1, %v1623_v60 }
 0x8ff   :  { %v1434_v41 = vpop.f32.mrf.mxu1 }
 0x900   :  { %v1446_v46 = vadd.f32 1e-06, %v1434_v41 }
 0x902   :  { %1454 = vrot.lane.b32.xlu1 %v1446_v46, %s3013_s28 }
 0x907   :  { %v1437_v62 = vpop.f32.mrf.mxu1 }
 0x908   :  { %v1447_v17 = vadd.f32 1e-06, %v1437_v62 }
 0x90a   :  { %1456 = vrot.lane.b32.xlu2 %v1447_v17, %s3013_s28 }
 0x90f   :  { %v3961_v30 = vpop.f32.mrf.mxu1 }
 0x910   :  { %v1448_v22 = vadd.f32 1e-06, %v3961_v30 }
 0x912   :  { %1458 = vrot.lane.b32.xlu0 %v1448_v22, %s3013_s28 }
 0x917   :  { %v3965_v0 = vpop.f32.mrf.mxu1 }
 0x918   :  { %v1449_v33 = vadd.f32 1e-06, %v3965_v0 }
 0x91a   :  { %1460 = vrot.lane.b32.xlu1 %v1449_v33, %s3013_s28  ;;  %1550 = vrot.lane.b32.xlu0 %v1548_v36, %s3013_s28 }
 0x922   :  { %1559 = vrot.lane.b32.xlu1 %v1557_v57, %s3013_s28 }
 0x964   :  { %v1457_v37 = vpop.permute.xlu2 %1456 }
 0x965   :  { %2713 = vrcp.f32 %v1457_v37  ;;  %v1492_v61 = vand.u32 2147483648, %v1457_v37  ;;  %vm1486_vm10 = vweird.f32 %v1457_v37  ;;  %v1490_v1 = vand.u32 2147483647, %v1457_v37 }
 0x967   :  { %v1493_v52 = vor.u32 1.1754944e-38, %v1492_v61  ;;  %vm1491_vm15 = vcmp.eq.f32.partialorder %v1490_v1, 8.507059e+37 }
 0x96b   :  { %v2714_v26 = vpop.eup %2713 }
 0x96c   :  { %v1482_v8 = vmul.f32 %v2714_v26, %v1457_v37  ;;  %vm1487_vm14 = vweird.f32 %v2714_v26 }
 0x96d   :  { %vm1488_vm13 = vmor %vm1486_vm10, %vm1487_vm14 }
 0x96e   :  { %v1483_v23 = vsub.f32 1.0, %v1482_v8 }
 0x970   :  { %v1484_v56 = vmul.f32 %v2714_v26, %v1483_v23 }
 0x972   :  { %v1485_v59 = vadd.f32 %v2714_v26, %v1484_v56 }
 0x974   :  { %v1455_v20 = vpop.permute.xlu1 %1454  ;;  %v1489_v5 = vsel %vm1488_vm13, %v2714_v26, %v1485_v59 }
 0x975   :  { %2715 = vrcp.f32 %v1455_v20  ;;  %v1477_v45 = vand.u32 2147483648, %v1455_v20  ;;  %v1475_v39 = vand.u32 2147483647, %v1455_v20  ;;  %vm1471_vm9 = vweird.f32 %v1455_v20 }
 0x976   :  { %v1494_v55 = vsel %vm1491_vm15, %v1493_v52, %v1489_v5 }
 0x977   :  { %v1478_v19 = vor.u32 1.1754944e-38, %v1477_v45  ;;  %vm1476_vm12 = vcmp.eq.f32.partialorder %v1475_v39, 8.507059e+37  ;;  %v1495_v27 = vmul.f32 %v1494_v55, %v1437_v62 }
 0x97b   :  { %v2716_v15 = vpop.eup %2715 }
 0x97c   :  { %v1467_v3 = vmul.f32 %v2716_v15, %v1455_v20  ;;  %vm1472_vm8 = vweird.f32 %v2716_v15 }
 0x97d   :  { %vm1473_vm11 = vmor %vm1471_vm9, %vm1472_vm8 }
 0x97e   :  { %v1468_v11 = vsub.f32 1.0, %v1467_v3 }
 0x980   :  { %v1469_v21 = vmul.f32 %v2716_v15, %v1468_v11 }
 0x982   :  { %v1470_v47 = vadd.f32 %v2716_v15, %v1469_v21 }
 0x984   :  { %v1459_v10 = vpop.permute.xlu0 %1458  ;;  %v1474_v40 = vsel %vm1473_vm11, %v2716_v15, %v1470_v47 }
 0x985   :  { %2717 = vrcp.f32 %v1459_v10  ;;  %v1479_v53 = vsel %vm1476_vm12, %v1478_v19, %v1474_v40  ;;  %v1507_v50 = vand.u32 2147483648, %v1459_v10  ;;  %v1505_v4 = vand.u32 2147483647, %v1459_v10 }
 0x986   :  { %v1480_v7 = vmul.f32 %v1479_v53, %v1434_v41  ;;  %vm1501_vm6 = vweird.f32 %v1459_v10 }
 0x987   :  { %v1508_v28 = vor.u32 1.1754944e-38, %v1507_v50  ;;  %vm1506_vm8 = vcmp.eq.f32.partialorder %v1505_v4, 8.507059e+37 }
 0x988   :  { %1530 = vrot.lane.b32.xlu2 %v1480_v7, %s3013_s28 }
 0x98b   :  { %v2718_v24 = vpop.eup %2717 }
 0x98c   :  { %v1497_v49 = vmul.f32 %v2718_v24, %v1459_v10  ;;  %v1461_v9 = vpop.permute.xlu1 %1460  ;;  %vm1502_vm5 = vweird.f32 %v2718_v24  ;;  %v1551_v62 = vpop.permute.xlu0 %1550  ;;  %v2498_v10 = vld [vmem:[%s4311_s8 + $0x40] sm:$0xff] }
 0x98d   :  { %2719 = vrcp.f32 %v1461_v9  ;;  %vm1503_vm7 = vmor %vm1501_vm6, %vm1502_vm5  ;;  %vm1516_vm9 = vweird.f32 %v1461_v9  ;;  %v1522_v51 = vand.u32 2147483648, %v1461_v9  ;;  %v1520_v16 = vand.u32 2147483647, %v1461_v9 }
 0x98e   :  { %v1498_v54 = vsub.f32 1.0, %v1497_v49 }
 0x98f   :  { %v1523_v2 = vor.u32 1.1754944e-38, %v1522_v51  ;;  %vm1521_vm14 = vcmp.eq.f32.partialorder %v1520_v16, 8.507059e+37  ;;  %v2765_v51 = vld [vmem:[#allocation2 + $0x20] sm:$0xff] }
 0x990   :  { %v1499_v13 = vmul.f32 %v2718_v24, %v1498_v54  ;;  %1532 = vrot.lane.b32.xlu2 %v1495_v27, %s3013_s28 }
 0x992   :  { %v1500_v31 = vadd.f32 %v2718_v24, %v1499_v13 }
 0x993   :  { %v2720_v38 = vpop.eup %2719 }
 0x994   :  { %v1512_v25 = vmul.f32 %v2720_v38, %v1461_v9  ;;  %v1504_v43 = vsel %vm1503_vm7, %v2718_v24, %v1500_v31  ;;  %vm1517_vm11 = vweird.f32 %v2720_v38 }
 0x995   :  { %v1509_v12 = vsel %vm1506_vm8, %v1508_v28, %v1504_v43  ;;  %vm1518_vm12 = vmor %vm1516_vm9, %vm1517_vm11  ;;  %v4390_v28 = vld [vmem:[#allocation32_spill] sm:$0xff]  ;;  %v2764_v43 = vld [vmem:[#allocation2 + $0x18] sm:$0xff] }
 0x996   :  { %v1513_v32 = vsub.f32 1.0, %v1512_v25  ;;  %v1510_v35 = vmul.f32 %v1509_v12, %v3961_v30  ;;  %v1560_v30 = vpop.permute.xlu1 %1559  ;;  %v2763_v25 = vld [vmem:[#allocation2 + $0x10] sm:$0xff]  ;;  %v2766_v12 = vld [vmem:[#allocation2 + $0x28] sm:$0xff] }
 0x998   :  { %v1514_v58 = vmul.f32 %v2720_v38, %v1513_v32  ;;  %1534 = vrot.lane.b32.xlu0 %v1510_v35, %s3013_s28  ;;  %v2767_v32 = vld [vmem:[#allocation2 + $0x30] sm:$0xff]  ;;  %v2768_v35 = vld [vmem:[#allocation2 + $0x38] sm:$0xff] }
 0x99a   :  { %v1515_v14 = vadd.f32 %v2720_v38, %v1514_v58 }
 0x99c   :  { %v1519_v48 = vsel %vm1518_vm12, %v2720_v38, %v1515_v14  ;;  %v4389_v38 = vld [vmem:[#allocation31_spill] sm:$0xff] }
 0x99d   :  { %v1524_v60 = vsel %vm1521_vm14, %v1523_v2, %v1519_v48 }
 0x99e   :  { %v1525_v41 = vmul.f32 %v1524_v60, %v3965_v0  ;;  %v2501_v0 = vld [vmem:[%s4311_s8 + $0x58] sm:$0xff] }
 0x99f   :  { %1658 = vmatpush.msra.mxu0 %v2501_v0 }
 0x9a0   :  { %1536 = vrot.lane.b32.xlu1 %v1525_v41, %s3013_s28 }
 0x9e2   :  { %v1531_v46 = vpop.permute.xlu2 %1530 }
 0x9e3   :  { %v1542_v17 = vadd.f32 %v1531_v46, %v3701_v6  ;;  %v2500_v6 = vld [vmem:[%s4311_s8 + $0x50] sm:$0xff] }
 0x9e4   :  { %1659 = vmatpush.msra.mxu0 %v2500_v6 }
 0x9e5   :  { %v1553_v22 = vmul.f32 %v1551_v62, %v1542_v17 }
 0x9e7   :  { %v1562_v33 = vadd.f32 %v1560_v30, %v1553_v22 }
 0x9e9   :  { %v1584_v36 = vmax.f32 %v1562_v33, 0.0 }
 0x9ea   :  { %v1533_v57 = vpop.permute.xlu2 %1532 }
 0x9eb   :  { %v1543_v37 = vadd.f32 %v1533_v57, %v3689_v44  ;;  %1592 = vrot.lane.b32.xlu2 %v1584_v36, %s3014_s11  ;;  %v2499_v44 = vld [vmem:[%s4311_s8 + $0x48] sm:$0xff]  ;;  %s2382_s8 = sshll.u32 %s3015_s6, 4  ;;  %s2383_s8 = int_to_ptr.vmem [resolvable:$true] %s2382_s8 }
 0x9ec   :  { %1660 = vmatpush.msra.mxu0 %v2499_v44 }
 0x9ed   :  { %v1554_v20 = vmul.f32 %v1551_v62, %v1543_v37  ;;  %v4089_v37 = vld [vmem:[#allocation11 + $0x2] ss:$0 sm:$0xff] }
 0x9ee   :  { %1661 = vmatpush.msra.mxu0 %v2498_v10 }
 0x9ef   :  { %v1563_v26 = vadd.f32 %v1560_v30, %v1554_v20 }
 0x9f1   :  { %v1585_v8 = vmax.f32 %v1563_v26, 0.0 }
 0x9f3   :  { %1594 = vrot.lane.b32.xlu0 %v1585_v8, %s3014_s11 }
 0xa0a   :  { %v1535_v15 = vpop.permute.xlu0 %1534 }
 0xa0b   :  { %v1544_v23 = vadd.f32 %v1535_v15, %v3693_v42 }
 0xa0d   :  { %v1555_v3 = vmul.f32 %v1551_v62, %v1544_v23 }
 0xa0f   :  { %v1564_v11 = vadd.f32 %v1560_v30, %v1555_v3 }
 0xa11   :  { %v1586_v45 = vmax.f32 %v1564_v11, 0.0 }
 0xa12   :  { %v1537_v56 = vpop.permute.xlu1 %1536 }
 0xa13   :  { %v1545_v21 = vadd.f32 %v1537_v56, %v3697_v18  ;;  %1596 = vrot.lane.b32.xlu1 %v1586_v45, %s3014_s11 }
 0xa15   :  { %v1556_v39 = vmul.f32 %v1551_v62, %v1545_v21  ;;  %v1726_v62 = vpop.f32.mrf.mxu1 }
 0xa17   :  { %v1565_v47 = vadd.f32 %v1560_v30, %v1556_v39 }
 0xa19   :  { %v1587_v19 = vmax.f32 %v1565_v47, 0.0 }
 0xa1b   :  { %1598 = vrot.lane.b32.xlu2 %v1587_v19, %s3014_s11 }
 0xa1d   :  { %v4087_v17 = vpop.f32.mrf.mxu1 }
 0xa25   :  { %v1732_v30 = vpop.f32.mrf.mxu1 }
 0xa26   :  { %v1733_v39 = vadd.f32 %v4089_v37, %v1732_v30 }
 0xa2d   :  { %v1735_v22 = vpop.f32.mrf.mxu1 }
 0xa2e   :  { %v1736_v20 = vadd.f32 %v4089_v37, %v1735_v22 }
 0xa35   :  { %v1738_v33 = vpop.f32.mrf.mxu1 }
 0xa3d   :  { %v1741_v36 = vpop.f32.mrf.mxu1 }
 0xa3e   :  { %v1742_v11 = vadd.f32 %v4089_v37, %v1741_v36 }
 0xa45   :  { %v1593_v40 = vpop.permute.xlu2 %1592  ;;  %v1744_v26 = vpop.f32.mrf.mxu1 }
 0xa46   :  { %v3998_v42 = vadd.f32 %v1593_v40, %v3670_v29  ;;  %v4387_v29 = vld [vmem:[#allocation30_spill] sm:$0xff]  ;;  %v1745_v6 = vadd.f32 %v4089_v37, %v1744_v26 }
 0xa48   :  { %2502 = vmatmul.msk.f32.vlgmr.msra.gmra.mxu0 %vm331_vm1, %v3998_v42 }
 0xa65   :  { %v1595_v18 = vpop.permute.xlu0 %1594 }
 0xa66   :  { %v4003_v59 = vadd.f32 %v1595_v18, %v3675_v34  ;;  %v2637_v34 = vld [vmem:[#allocation8 + $0x2] ss:$0 sm:$0xff] }
 0xa68   :  { %2503 = vmatmul.msk.f32.gmra.mxu0 %vm331_vm1, %v4003_v59 }
 0xa75   :  { %v1599_v7 = vpop.permute.xlu2 %1598 }
 0xa76   :  { %v4013_v1 = vadd.f32 %v1599_v7, %v4387_v29  ;;  %v1747_v29 = vpop.f32.mrf.mxu1 }
 0xa85   :  { %v1597_v61 = vpop.permute.xlu1 %1596 }
 0xa86   :  { %v4008_v53 = vadd.f32 %v1597_v61, %v3680_v63  ;;  %v1727_v61 = vadd.f32 %v4089_v37, %v1726_v62 }
 0xa88   :  { %2504 = vmatmul.msk.f32.gmra.mxu0 %vm331_vm1, %v4008_v53 }
 0xa90   :  { %2505 = vmatmul.msk.f32.gmra.mxu0 %vm331_vm1, %v4013_v1 }
 0xac5   :  { %v1663_v5 = vpop.f32.mrf.mxu0 }
 0xac6   :  { %v4029_v54 = vadd.f32 %v2637_v34, %v1663_v5 }
 0xae5   :  { %v1666_v52 = vpop.f32.mrf.mxu0 }
 0xae6   :  { %v4017_v24 = vadd.f32 %v2637_v34, %v1666_v52  ;;  %v1748_v52 = vadd.f32 %v4089_v37, %v1747_v29 }
 0xae8   :  { %1756 = vrot.lane.b32.xlu2 %v4017_v24, %s3013_s28 }
 0xb05   :  { %v1669_v63 = vpop.f32.mrf.mxu0 }
 0xb06   :  { %v4021_v55 = vadd.f32 %v2637_v34, %v1669_v63 }
 0xb08   :  { %1758 = vrot.lane.b32.xlu1 %v4021_v55, %s3013_s28 }
 0xb0d   :  { %v1672_v49 = vpop.f32.mrf.mxu0 }
 0xb0e   :  { %v4025_v9 = vadd.f32 %v2637_v34, %v1672_v49 }
 0xb10   :  { %1760 = vrot.lane.b32.xlu0 %v4025_v9, %s3013_s28 }
 0xb18   :  { %1754 = vrot.lane.b32.xlu0 %v4029_v54, %s3013_s28 }
 0xb42   :  { %v1757_v4 = vpop.permute.xlu2 %1756 }
 0xb7a   :  { %v1759_v13 = vpop.permute.xlu1 %1758 }
 0xb82   :  { %v1761_v27 = vpop.permute.xlu0 %1760 }
 0xb83   :  { %2515 = vmatpush.msk.msrb.mxu0 %vm3244_vm3, %v1761_v27 }
 0xb85   :  { %2517 = vmatpush.msk.msrb.mxu0 %vm3244_vm3, %v1759_v13 }
 0xb87   :  { %2519 = vmatpush.msk.msrb.mxu0 %vm3244_vm3, %v1757_v4 }
 0xb8a   :  { %v1755_v31 = vpop.permute.xlu0 %1754 }
 0xb8b   :  { %2521 = vmatpush.msk.msrb.mxu0 %vm3244_vm3, %v1755_v31 }
 0xb8d   :  { %1782 = vmatpush.msrb.mxu0 %v4025_v9 }
 0xb8f   :  { %1783 = vmatpush.msrb.mxu0 %v4021_v55 }
 0xb91   :  { %1784 = vmatpush.msrb.mxu0 %v4017_v24 }
 0xb93   :  { %1785 = vmatpush.msrb.mxu0 %v4029_v54 }
 0xb94   :  { %2522 = vmatmul.msk.f32.vlgmr.msrb.gmra.mxu0 %vm466_vm4, %v4389_v38 }
 0xb9c   :  { %2523 = vmatmul.msk.f32.gmra.mxu0 %vm466_vm4, %v4390_v28 }
 0xba4   :  { %2524 = vmatmul.msk.f32.gmra.mxu0 %vm466_vm4, %v2763_v25 }
 0xbac   :  { %2525 = vmatmul.msk.f32.gmra.mxu0 %vm466_vm4, %v2764_v43 }
 0xbb4   :  { %2526 = vmatmul.msk.f32.gmra.mxu0 %vm466_vm4, %v2765_v51  ;;  %v1739_v51 = vadd.f32 %v4089_v37, %v1738_v33 }
 0xbbc   :  { %2527 = vmatmul.msk.f32.gmra.mxu0 %vm466_vm4, %v2766_v12 }
 0xbc4   :  { %2528 = vmatmul.msk.f32.gmra.mxu0 %vm466_vm4, %v2767_v32 }
 0xbcc   :  { %2529 = vmatmul.msk.f32.gmra.mxu0 %vm466_vm4, %v2768_v35 }
 0xc11   :  { %v4055_v16 = vpop.f32.mrf.mxu0 }
 0xc19   :  { %v4057_v58 = vpop.f32.mrf.mxu0 }
 0xc21   :  { %v4059_v2 = vpop.f32.mrf.mxu0 }
 0xc29   :  { %v4061_v14 = vpop.f32.mrf.mxu0 }
 0xc31   :  { %v4063_v48 = vpop.f32.mrf.mxu0 }
 0xc39   :  { %v4065_v60 = vpop.f32.mrf.mxu0 }
 0xc3a   :  { %1829 = vrot.lane.b32.xlu0 %v4065_v60, %s3013_s28 }
 0xc41   :  { %v4069_v41 = vpop.f32.mrf.mxu0 }
 0xc42   :  { %1823 = vrot.lane.b32.xlu0 %v4059_v2, %s3013_s28  ;;  %1831 = vrot.lane.b32.xlu2 %v4069_v41, %s3013_s28 }
 0xc49   :  { %v4075_v46 = vpop.f32.mrf.mxu0 }
 0xc4a   :  { %1825 = vrot.lane.b32.xlu2 %v4061_v14, %s3013_s28  ;;  %1833 = vrot.lane.b32.xlu1 %v4075_v46, %s3013_s28 }
 0xc52   :  { %1819 = vrot.lane.b32.xlu2 %v4055_v16, %s3013_s28  ;;  %1827 = vrot.lane.b32.xlu1 %v4063_v48, %s3013_s28 }
 0xc5a   :  { %1821 = vrot.lane.b32.xlu1 %v4057_v58, %s3013_s28 }
 0xc9c   :  { %v1832_v57 = vpop.permute.xlu2 %1831 }
 0xc9d   :  { %v1849_v15 = vadd.f32 %v1832_v57, %v1745_v6 }
 0xc9f   :  { %v2536_v23 = vmul.f32 -1.442695, %v1849_v15 }
 0xca4   :  { %v1826_v8 = vpop.permute.xlu2 %1825 }
 0xca5   :  { %v1846_v0 = vadd.f32 %v1826_v8, %v1736_v20 }
 0xca7   :  { %v2533_v44 = vmul.f32 -1.442695, %v1846_v0 }
 0xca9   :  { %2721 = vpow2.f32 %v2533_v44  ;;  %v1730_v44 = vadd.f32 %v4089_v37, %v4087_v17 }
 0xcaa   :  { %2723 = vpow2.f32 %v2536_v23 }
 0xcac   :  { %v1830_v3 = vpop.permute.xlu0 %1829  ;;  %v1820_v10 = vpop.permute.xlu2 %1819 }
 0xcad   :  { %v1848_v56 = vadd.f32 %v1830_v3, %v1742_v11  ;;  %v1843_v5 = vadd.f32 %v1820_v10, %v1727_v61 }
 0xcaf   :  { %v2722_v45 = vpop.eup %2721  ;;  %v2535_v47 = vmul.f32 -1.442695, %v1848_v56  ;;  %v2530_v49 = vmul.f32 -1.442695, %v1843_v5 }
 0xcb0   :  { %v4094_v21 = vadd.f32 1.0, %v2722_v45  ;;  %v2724_v18 = vpop.eup %2723 }
 0xcb1   :  { %v4099_v34 = vadd.f32 1.0, %v2724_v18 }
 0xcb2   :  { %2725 = vrcp.f32 %v4094_v21  ;;  %vm1933_vm10 = vweird.f32 %v4094_v21  ;;  %v1937_v45 = vand.u32 2147483647, %v4094_v21  ;;  %v1939_v56 = vand.u32 2147483648, %v4094_v21 }
 0xcb3   :  { %2727 = vpow2.f32 %v2535_v47  ;;  %vm1978_vm11 = vweird.f32 %v4099_v34 }
 0xcb4   :  { %v1824_v19 = vpop.permute.xlu0 %1823  ;;  %vm1938_vm8 = vcmp.eq.f32.partialorder %v1937_v45, 8.507059e+37 }
 0xcb5   :  { %v1845_v40 = vadd.f32 %v1824_v19, %v1733_v39 }
 0xcb7   :  { %v2532_v7 = vmul.f32 -1.442695, %v1845_v40 }
 0xcb8   :  { %v4102_v63 = vpop.eup %2725 }
 0xcb9   :  { %2729 = vpow2.f32 %v2532_v7  ;;  %v2728_v13 = vpop.eup %2727  ;;  %v1929_v31 = vmul.f32 %v4102_v63, %v4094_v21  ;;  %vm1934_vm3 = vweird.f32 %v4102_v63 }
 0xcba   :  { %2731 = vrcp.f32 %v4099_v34  ;;  %v4107_v25 = vadd.f32 1.0, %v2728_v13  ;;  %vm4133_vm15 = vmor %vm1933_vm10, %vm1934_vm3 }
 0xcbb   :  { %2733 = vpow2.f32 %v2530_v49  ;;  %v1930_v12 = vsub.f32 1.0, %v1929_v31 }
 0xcbc   :  { %v1834_v27 = vpop.permute.xlu1 %1833 }
 0xcbd   :  { %v1850_v50 = vadd.f32 %v1834_v27, %v1748_v52  ;;  %v1931_v57 = vmul.f32 %v4102_v63, %v1930_v12  ;;  %v1940_v52 = vor.u32 1.1754944e-38, %v1939_v56 }
 0xcbf   :  { %v2730_v4 = vpop.eup %2729  ;;  %v2537_v38 = vmul.f32 -1.442695, %v1850_v50  ;;  %v1932_v23 = vadd.f32 %v4102_v63, %v1931_v57 }
 0xcc0   :  { %v1877_v28 = vadd.f32 1.0, %v2730_v4  ;;  %v4109_v43 = vpop.eup %2731 }
 0xcc1   :  { %2735 = vpow2.f32 %v2537_v38  ;;  %v2734_v62 = vpop.eup %2733  ;;  %v1974_v30 = vmul.f32 %v4109_v43, %v4099_v34  ;;  %vm1979_vm5 = vweird.f32 %v4109_v43  ;;  %v1936_v61 = vsel %vm4133_vm15, %v4102_v63, %v1932_v23 }
 0xcc2   :  { %2737 = vrcp.f32 %v1877_v28  ;;  %v4118_v0 = vadd.f32 1.0, %v2734_v62  ;;  %v1924_v11 = vand.u32 2147483648, %v1877_v28  ;;  %v1922_v19 = vand.u32 2147483647, %v1877_v28  ;;  %vm4161_vm12 = vmor %vm1978_vm11, %vm1979_vm5 }
 0xcc3   :  { %2739 = vrcp.f32 %v4107_v25  ;;  %v1975_v33 = vsub.f32 1.0, %v1974_v30  ;;  %vm1918_vm6 = vweird.f32 %v1877_v28  ;;  %v4148_v13 = vsel %vm1938_vm8, %v1940_v52, %v1936_v61 }
 0xcc4   :  { %v1828_v32 = vpop.permute.xlu1 %1827  ;;  %v1925_v5 = vor.u32 1.1754944e-38, %v1924_v11  ;;  %vm1923_vm9 = vcmp.eq.f32.partialorder %v1922_v19, 8.507059e+37  ;;  %v1969_v19 = vand.u32 2147483648, %v4107_v25 }
 0xcc5   :  { %v1847_v35 = vadd.f32 %v1828_v32, %v1739_v51  ;;  %v1976_v10 = vmul.f32 %v4109_v43, %v1975_v33  ;;  %v1984_v51 = vand.u32 2147483648, %v4099_v34 }
 0xcc7   :  { %v2736_v22 = vpop.eup %2735  ;;  %v2534_v36 = vmul.f32 -1.442695, %v1847_v35  ;;  %v1977_v63 = vadd.f32 %v4109_v43, %v1976_v10  ;;  %v1982_v35 = vand.u32 2147483647, %v4099_v34  ;;  %v1985_v34 = vor.u32 1.1754944e-38, %v1984_v51 }
 0xcc8   :  { %v2738_v20 = vpop.eup %2737  ;;  %v4116_v26 = vadd.f32 1.0, %v2736_v22  ;;  %v1967_v10 = vand.u32 2147483647, %v4107_v25 }
 0xcc9   :  { %v1914_v8 = vmul.f32 %v2738_v20, %v1877_v28  ;;  %2741 = vpow2.f32 %v2534_v36  ;;  %v4121_v6 = vpop.eup %2739  ;;  %vm1919_vm13 = vweird.f32 %v2738_v20  ;;  %v1981_v22 = vsel %vm4161_vm12, %v4109_v43, %v1977_v63 }
 0xcca   :  { %2743 = vrcp.f32 %v4116_v26  ;;  %v1959_v17 = vmul.f32 %v4121_v6, %v4107_v25  ;;  %vm1920_vm7 = vmor %vm1918_vm6, %vm1919_vm13  ;;  %v1999_v12 = vand.u32 2147483648, %v4116_v26  ;;  %v1997_v30 = vand.u32 2147483647, %v4116_v26 }
 0xccb   :  { %v1915_v15 = vsub.f32 1.0, %v1914_v8  ;;  %2745 = vrcp.f32 %v4118_v0  ;;  %vm1993_vm3 = vweird.f32 %v4116_v26  ;;  %vm1983_vm13 = vcmp.eq.f32.partialorder %v1982_v35, 8.507059e+37 }
 0xccc   :  { %v1822_v3 = vpop.permute.xlu1 %1821  ;;  %v1960_v38 = vsub.f32 1.0, %v1959_v17  ;;  %vm1998_vm15 = vcmp.eq.f32.partialorder %v1997_v30, 8.507059e+37  ;;  %v1986_v43 = vsel %vm1983_vm13, %v1985_v34, %v1981_v22  ;;  %vm1964_vm5 = vweird.f32 %v4121_v6 }
 0xccd   :  { %v1844_v39 = vadd.f32 %v1822_v3, %v1730_v44  ;;  %v1916_v47 = vmul.f32 %v2738_v20, %v1915_v15  ;;  %v2000_v15 = vor.u32 1.1754944e-38, %v1999_v12  ;;  %vm1963_vm6 = vweird.f32 %v4107_v25 }
 0xcce   :  { %v1961_v8 = vmul.f32 %v4121_v6, %v1960_v38  ;;  %vm1965_vm8 = vmor %vm1963_vm6, %vm1964_vm5  ;;  %v1892_v38 = vand.u32 2147483647, %v4118_v0 }
 0xccf   :  { %v2742_v40 = vpop.eup %2741  ;;  %v2531_v18 = vmul.f32 -1.442695, %v1844_v39  ;;  %v1917_v21 = vadd.f32 %v2738_v20, %v1916_v47 }
 0xcd0   :  { %v2744_v7 = vpop.eup %2743  ;;  %v4142_v29 = vadd.f32 1.0, %v2742_v40 }
 0xcd1   :  { %v1989_v49 = vmul.f32 %v2744_v7, %v4116_v26  ;;  %2747 = vpow2.f32 %v2531_v18  ;;  %v1921_v27 = vsel %vm1920_vm7, %v2738_v20, %v1917_v21  ;;  %v4153_v28 = vpop.eup %2745  ;;  %vm1994_vm14 = vweird.f32 %v2744_v7 }
 0xcd2   :  { %2749 = vrcp.f32 %v4142_v29  ;;  %v4146_v50 = vsel %vm1923_vm9, %v1925_v5, %v1921_v27  ;;  %v1884_v57 = vmul.f32 %v4153_v28, %v4118_v0  ;;  %vm1995_vm10 = vmor %vm1993_vm3, %vm1994_vm14  ;;  %v1962_v26 = vadd.f32 %v4121_v6, %v1961_v8 }
 0xcd3   :  { %v2620_v4 = vpack.i.bf16 %v4146_v50, %v4148_v13  ;;  %v1990_v31 = vsub.f32 1.0, %v1989_v49  ;;  %v1954_v47 = vand.u32 2147483648, %v4142_v29  ;;  %v1952_v37 = vand.u32 2147483647, %v4142_v29 }
 0xcd4   :  { %v1885_v39 = vsub.f32 1.0, %v1884_v57  ;;  %vm1948_vm9 = vweird.f32 %v4142_v29  ;;  %v1966_v18 = vsel %vm1965_vm8, %v4121_v6, %v1962_v26  ;;  %v1970_v5 = vor.u32 1.1754944e-38, %v1969_v19 }
 0xcd5   :  { %2621 = vrot.lane.b32.xlu2 %v2620_v4, %s3014_s11  ;;  %v1991_v62 = vmul.f32 %v2744_v7, %v1990_v31  ;;  %vm1953_vm12 = vcmp.eq.f32.partialorder %v1952_v37, 8.507059e+37  ;;  %vm1968_vm14 = vcmp.eq.f32.partialorder %v1967_v10, 8.507059e+37  ;;  %vm1889_vm3 = vweird.f32 %v4153_v28 }
 0xcd6   :  { %v1886_v21 = vmul.f32 %v4153_v28, %v1885_v39  ;;  %v1971_v63 = vsel %vm1968_vm14, %v1970_v5, %v1966_v18  ;;  %v1894_v6 = vand.u32 2147483648, %v4118_v0  ;;  %v2005_v19 = vmul.f32 %v4146_v50, %v4059_v2  ;;  %v2769_v2 = vld [vmem:[%s4370_s17] sm:$0xff]  ;;  %v2772_v50 = vld [vmem:[%s4370_s17 + $0x18] sm:$0xff] }
 0xcd7   :  { %v2748_v36 = vpop.eup %2747  ;;  %v1992_v20 = vadd.f32 %v2744_v7, %v1991_v62 }
 0xcd8   :  { %v2750_v33 = vpop.eup %2749  ;;  %v1876_v44 = vadd.f32 1.0, %v2748_v36  ;;  %v1887_v25 = vadd.f32 %v4153_v28, %v1886_v21  ;;  %v1895_v62 = vor.u32 1.1754944e-38, %v1894_v6 }
 0xcd9   :  { %v1944_v23 = vmul.f32 %v2750_v33, %v4142_v29  ;;  %v1996_v3 = vsel %vm1995_vm10, %v2744_v7, %v1992_v20  ;;  %vm1949_vm7 = vweird.f32 %v2750_v33  ;;  %v1955_v7 = vor.u32 1.1754944e-38, %v1954_v47 }
 0xcda   :  { %2751 = vrcp.f32 %v1876_v44  ;;  %v2001_v11 = vsel %vm1998_vm15, %v2000_v15, %v1996_v3  ;;  %vm1950_vm11 = vmor %vm1948_vm9, %vm1949_vm7  ;;  %vm1888_vm10 = vweird.f32 %v4118_v0  ;;  %v1909_v31 = vand.u32 2147483648, %v1876_v44 }
 0xcdb   :  { %v2610_v45 = vpack.i.bf16 %v1986_v43, %v2001_v11  ;;  %v1945_v56 = vsub.f32 1.0, %v1944_v23  ;;  %v1907_v12 = vand.u32 2147483647, %v1876_v44  ;;  %vm1890_vm15 = vmor %vm1888_vm10, %vm1889_vm3  ;;  %vm1903_vm5 = vweird.f32 %v1876_v44 }
 0xcdc   :  { %v1891_v32 = vsel %vm1890_vm15, %v4153_v28, %v1887_v25  ;;  %v1910_v30 = vor.u32 1.1754944e-38, %v1909_v31  ;;  %vm1893_vm7 = vcmp.eq.f32.partialorder %v1892_v38, 8.507059e+37  ;;  %v2010_v8 = vmul.f32 %v2001_v11, %v4075_v46 }
 0xcdd   :  { %2611 = vrot.lane.b32.xlu0 %v2610_v45, %s3014_s11  ;;  %v1946_v17 = vmul.f32 %v2750_v33, %v1945_v56  ;;  %vm1908_vm8 = vcmp.eq.f32.partialorder %v1907_v12, 8.507059e+37  ;;  %v1896_v36 = vsel %vm1893_vm7, %v1895_v62, %v1891_v32  ;;  %v2009_v28 = vmul.f32 %v1986_v43, %v4069_v41 }
 0xcde   :  { %v2008_v45 = vmul.f32 %v1971_v63, %v4065_v60  ;;  %v2006_v41 = vmul.f32 %v4148_v13, %v4061_v14  ;;  %v2003_v14 = vmul.f32 %v1896_v36, %v4055_v16  ;;  %v2771_v16 = vld [vmem:[%s4370_s17 + $0x10] sm:$0xff] }
 0xcdf   :  { %v1947_v40 = vadd.f32 %v2750_v33, %v1946_v17 }
 0xce0   :  { %v2752_v61 = vpop.eup %2751 }
 0xce1   :  { %v1899_v52 = vmul.f32 %v2752_v61, %v1876_v44  ;;  %v1951_v49 = vsel %vm1950_vm11, %v2750_v33, %v1947_v40  ;;  %vm1904_vm13 = vweird.f32 %v2752_v61 }
 0xce2   :  { %v1956_v27 = vsel %vm1953_vm12, %v1955_v7, %v1951_v49  ;;  %vm1905_vm6 = vmor %vm1903_vm5, %vm1904_vm13 }
 0xce3   :  { %v2615_v4 = vpack.i.bf16 %v1956_v27, %v1971_v63  ;;  %v1900_v29 = vsub.f32 1.0, %v1899_v52  ;;  %v2007_v39 = vmul.f32 %v1956_v27, %v4063_v48 }
 0xce5   :  { %2616 = vrot.lane.b32.xlu1 %v2615_v4, %s3014_s11  ;;  %v1901_v51 = vmul.f32 %v2752_v61, %v1900_v29  ;;  %v2542_v4 = vld [vmem:[%s4315_s12 + $0x8] sm:$0xf] }
 0xce6   :  { %v2182_v25 = vperm.slane %v2542_v4, 0  ;;  %v2191_v29 = vperm.slane %v2542_v4, 1 }
 0xce7   :  { %v1902_v35 = vadd.f32 %v2752_v61, %v1901_v51 }
 0xce9   :  { %v1906_v22 = vsel %vm1905_vm6, %v2752_v61, %v1902_v35 }
 0xcea   :  { %v1911_v57 = vsel %vm1908_vm8, %v1910_v30, %v1906_v22 }
 0xceb   :  { %v2625_v20 = vpack.i.bf16 %v1896_v36, %v1911_v57  ;;  %v2004_v48 = vmul.f32 %v1911_v57, %v4057_v58  ;;  %v2770_v58 = vld [vmem:[%s4370_s17 + $0x8] sm:$0xff] }
 0xced   :  { %2626 = vrot.lane.b32.xlu0 %v2625_v20, %s3014_s11 }
 0xd2f   :  { %v2622_v23 = vpop.permute.xlu2 %2621 }
 0xd30   :  { %v2623_v47 = vunpack.i.l.bf16 %v2622_v23  ;;  %v2624_v43 = vunpack.i.h.bf16 %v2622_v23 }
 0xd32   :  { %v2046_v60 = vsel %vm331_vm1, %v2006_v41, %v2623_v47  ;;  %v2045_v40 = vsel %vm331_vm1, %v2005_v19, %v2624_v43 }
 0xd4f   :  { %v2612_v0 = vpop.permute.xlu0 %2611 }
 0xd50   :  { %v2614_v33 = vunpack.i.h.bf16 %v2612_v0  ;;  %v2613_v34 = vunpack.i.l.bf16 %v2612_v0 }
 0xd52   :  { %v2050_v44 = vsel %vm331_vm1, %v2010_v8, %v2613_v34  ;;  %v2049_v15 = vsel %vm331_vm1, %v2009_v28, %v2614_v33 }
 0xd53   :  { %2059 = vmatpush.msrb.mxu2 %v2050_v44 }
 0xd55   :  { %2060 = vmatpush.msrb.mxu2 %v2049_v15 }
 0xd57   :  { %v2617_v3 = vpop.permute.xlu1 %2616 }
 0xd58   :  { %v2619_v56 = vunpack.i.h.bf16 %v2617_v3  ;;  %v2618_v26 = vunpack.i.l.bf16 %v2617_v3 }
 0xd5a   :  { %v2048_v46 = vsel %vm331_vm1, %v2008_v45, %v2618_v26  ;;  %v2047_v11 = vsel %vm331_vm1, %v2007_v39, %v2619_v56 }
 0xd5b   :  { %2061 = vmatpush.msrb.mxu2 %v2048_v46 }
 0xd5d   :  { %2062 = vmatpush.msrb.mxu2 %v2047_v11 }
 0xd5f   :  { %v2627_v17 = vpop.permute.xlu0 %2626  ;;  %2063 = vmatpush.msrb.mxu2 %v2046_v60 }
 0xd60   :  { %v2629_v37 = vunpack.i.h.bf16 %v2627_v17  ;;  %v2628_v10 = vunpack.i.l.bf16 %v2627_v17 }
 0xd61   :  { %2064 = vmatpush.msrb.mxu2 %v2045_v40 }
 0xd62   :  { %v2044_v13 = vsel %vm331_vm1, %v2004_v48, %v2628_v10  ;;  %v2043_v18 = vsel %vm331_vm1, %v2003_v14, %v2629_v37 }
 0xd63   :  { %2065 = vmatpush.msrb.mxu2 %v2044_v13 }
 0xd65   :  { %2066 = vmatpush.msrb.mxu2 %v2043_v18 }
 0xd66   :  { %2538 = vmatmul.msk.f32.vlgmr.msrb.gmra.mxu2 %vm466_vm4, %v2769_v2 }
 0xd6e   :  { %2539 = vmatmul.msk.f32.gmra.mxu2 %vm466_vm4, %v2770_v58 }
 0xd76   :  { %2540 = vmatmul.msk.f32.gmra.mxu2 %vm466_vm4, %v2771_v16 }
 0xd7e   :  { %2541 = vmatmul.msk.f32.gmra.mxu2 %vm466_vm4, %v2772_v50 }
 0xde9   :  { %v2068_v21 = vpop.f32.mrf.mxu2 }
 0xdea   :  { %v2080_v61 = vadd.f32 1e-06, %v2068_v21 }
 0xdec   :  { %2088 = vrot.lane.b32.xlu1 %v2080_v61, %s3013_s28 }
 0xdf1   :  { %v2071_v7 = vpop.f32.mrf.mxu2 }
 0xdf2   :  { %v2081_v5 = vadd.f32 1e-06, %v2071_v7 }
 0xdf4   :  { %2090 = vrot.lane.b32.xlu2 %v2081_v5, %s3013_s28 }
 0xdf9   :  { %v4230_v52 = vpop.f32.mrf.mxu2 }
 0xdfa   :  { %v2082_v49 = vadd.f32 1e-06, %v4230_v52 }
 0xdfc   :  { %2092 = vrot.lane.b32.xlu0 %v2082_v49, %s3013_s28 }
 0xe01   :  { %v4234_v27 = vpop.f32.mrf.mxu2 }
 0xe02   :  { %v2083_v63 = vadd.f32 1e-06, %v4234_v27 }
 0xe04   :  { %2094 = vrot.lane.b32.xlu1 %v2083_v63, %s3013_s28  ;;  %2184 = vrot.lane.b32.xlu0 %v2182_v25, %s3013_s28 }
 0xe0c   :  { %2193 = vrot.lane.b32.xlu1 %v2191_v29, %s3013_s28 }
 0xe4e   :  { %v2091_v6 = vpop.permute.xlu2 %2090 }
 0xe4f   :  { %2753 = vrcp.f32 %v2091_v6  ;;  %v2126_v28 = vand.u32 2147483648, %v2091_v6  ;;  %vm2120_vm3 = vweird.f32 %v2091_v6  ;;  %v2124_v23 = vand.u32 2147483647, %v2091_v6 }
 0xe51   :  { %v2127_v45 = vor.u32 1.1754944e-38, %v2126_v28  ;;  %vm2125_vm13 = vcmp.eq.f32.partialorder %v2124_v23, 8.507059e+37 }
 0xe55   :  { %v2754_v38 = vpop.eup %2753 }
 0xe56   :  { %v2116_v51 = vmul.f32 %v2754_v38, %v2091_v6  ;;  %vm2121_vm14 = vweird.f32 %v2754_v38 }
 0xe57   :  { %vm2122_vm10 = vmor %vm2120_vm3, %vm2121_vm14 }
 0xe58   :  { %v2117_v32 = vsub.f32 1.0, %v2116_v51 }
 0xe5a   :  { %v2118_v22 = vmul.f32 %v2754_v38, %v2117_v32 }
 0xe5c   :  { %v2119_v34 = vadd.f32 %v2754_v38, %v2118_v22 }
 0xe5e   :  { %v2089_v31 = vpop.permute.xlu1 %2088  ;;  %v2123_v3 = vsel %vm2122_vm10, %v2754_v38, %v2119_v34 }
 0xe5f   :  { %2755 = vrcp.f32 %v2089_v31  ;;  %v2111_v30 = vand.u32 2147483648, %v2089_v31  ;;  %v2109_v57 = vand.u32 2147483647, %v2089_v31  ;;  %vm2105_vm9 = vweird.f32 %v2089_v31 }
 0xe60   :  { %v2128_v26 = vsel %vm2125_vm13, %v2127_v45, %v2123_v3 }
 0xe61   :  { %v2112_v0 = vor.u32 1.1754944e-38, %v2111_v30  ;;  %vm2110_vm12 = vcmp.eq.f32.partialorder %v2109_v57, 8.507059e+37  ;;  %v2129_v41 = vmul.f32 %v2128_v26, %v2071_v7 }
 0xe65   :  { %v2756_v12 = vpop.eup %2755 }
 0xe66   :  { %v2101_v35 = vmul.f32 %v2756_v12, %v2089_v31  ;;  %vm2106_vm4 = vweird.f32 %v2756_v12 }
 0xe67   :  { %vm2107_vm11 = vmor %vm2105_vm9, %vm2106_vm4 }
 0xe68   :  { %v2102_v62 = vsub.f32 1.0, %v2101_v35 }
 0xe6a   :  { %v2103_v36 = vmul.f32 %v2756_v12, %v2102_v62 }
 0xe6c   :  { %v2104_v20 = vadd.f32 %v2756_v12, %v2103_v36 }
 0xe6e   :  { %v2093_v8 = vpop.permute.xlu0 %2092  ;;  %v2108_v33 = vsel %vm2107_vm11, %v2756_v12, %v2104_v20 }
 0xe6f   :  { %2757 = vrcp.f32 %v2093_v8  ;;  %v2113_v44 = vsel %vm2110_vm12, %v2112_v0, %v2108_v33  ;;  %v2141_v43 = vand.u32 2147483648, %v2093_v8  ;;  %v2139_v19 = vand.u32 2147483647, %v2093_v8  ;;  %v2224_v33 = vld [vmem:[%s4316_s13] sm:$0xff] }
 0xe70   :  { %v2114_v15 = vmul.f32 %v2113_v44, %v2068_v21  ;;  %vm2135_vm5 = vweird.f32 %v2093_v8 }
 0xe71   :  { %v2142_v48 = vor.u32 1.1754944e-38, %v2141_v43  ;;  %vm2140_vm7 = vcmp.eq.f32.partialorder %v2139_v19, 8.507059e+37 }
 0xe72   :  { %2164 = vrot.lane.b32.xlu2 %v2114_v15, %s3013_s28 }
 0xe75   :  { %v2758_v56 = vpop.eup %2757 }
 0xe76   :  { %v2131_v39 = vmul.f32 %v2758_v56, %v2093_v8  ;;  %v2095_v47 = vpop.permute.xlu1 %2094  ;;  %vm2136_vm15 = vweird.f32 %v2758_v56  ;;  %v2185_v49 = vpop.permute.xlu0 %2184 }
 0xe77   :  { %2759 = vrcp.f32 %v2095_v47  ;;  %vm2137_vm6 = vmor %vm2135_vm5, %vm2136_vm15  ;;  %vm2150_vm8 = vweird.f32 %v2095_v47  ;;  %v2156_v40 = vand.u32 2147483648, %v2095_v47  ;;  %v2154_v2 = vand.u32 2147483647, %v2095_v47 }
 0xe78   :  { %v2132_v46 = vsub.f32 1.0, %v2131_v39 }
 0xe79   :  { %v2157_v16 = vor.u32 1.1754944e-38, %v2156_v40  ;;  %vm2155_vm11 = vcmp.eq.f32.partialorder %v2154_v2, 8.507059e+37 }
 0xe7a   :  { %v2133_v11 = vmul.f32 %v2758_v56, %v2132_v46  ;;  %2166 = vrot.lane.b32.xlu2 %v2129_v41, %s3013_s28 }
 0xe7c   :  { %v2134_v60 = vadd.f32 %v2758_v56, %v2133_v11 }
 0xe7d   :  { %v2760_v17 = vpop.eup %2759 }
 0xe7e   :  { %v2146_v37 = vmul.f32 %v2760_v17, %v2095_v47  ;;  %v2138_v10 = vsel %vm2137_vm6, %v2758_v56, %v2134_v60  ;;  %vm2151_vm4 = vweird.f32 %v2760_v17 }
 0xe7f   :  { %v2143_v14 = vsel %vm2140_vm7, %v2142_v48, %v2138_v10  ;;  %vm2152_vm9 = vmor %vm2150_vm8, %vm2151_vm4  ;;  %v2639_v48 = vld [vmem:[#allocation13] ss:$0 sm:$0xff] }
 0xe80   :  { %v2147_v13 = vsub.f32 1.0, %v2146_v37  ;;  %v2144_v18 = vmul.f32 %v2143_v14, %v4230_v52  ;;  %v2194_v52 = vpop.permute.xlu1 %2193 }
 0xe82   :  { %v2148_v58 = vmul.f32 %v2760_v17, %v2147_v13  ;;  %2168 = vrot.lane.b32.xlu0 %v2144_v18, %s3013_s28 }
 0xe84   :  { %v2149_v50 = vadd.f32 %v2760_v17, %v2148_v58 }
 0xe86   :  { %v2153_v21 = vsel %vm2152_vm9, %v2760_v17, %v2149_v50  ;;  %v2328_v17 = vld [vmem:[#allocation14] sm:$0xff] }
 0xe87   :  { %v2158_v61 = vsel %vm2155_vm11, %v2157_v16, %v2153_v21 }
 0xe88   :  { %v2159_v7 = vmul.f32 %v2158_v61, %v4234_v27  ;;  %v2227_v27 = vld [vmem:[%s4316_s13 + $0x18] sm:$0xff] }
 0xe89   :  { %2256 = vmatpush.msra.mxu3 %v2227_v27 }
 0xe8a   :  { %2170 = vrot.lane.b32.xlu1 %v2159_v7, %s3013_s28  ;;  %v2640_v7 = vld [vmem:[%s4321_s18] ss:$0 sm:$0xff] }
 0xecc   :  { %v2165_v5 = vpop.permute.xlu2 %2164 }
 0xecd   :  { %v2176_v63 = vadd.f32 %v2165_v5, %v4029_v54  ;;  %v2226_v54 = vld [vmem:[%s4316_s13 + $0x10] sm:$0xff] }
 0xece   :  { %2257 = vmatpush.msra.mxu3 %v2226_v54 }
 0xecf   :  { %v2187_v4 = vmul.f32 %v2185_v49, %v2176_v63 }
 0xed1   :  { %v2196_v25 = vadd.f32 %v2194_v52, %v2187_v4 }
 0xed3   :  { %v2200_v29 = vmax.f32 %v2196_v25, 0.0 }
 0xed4   :  { %v2167_v6 = vpop.permute.xlu2 %2166 }
 0xed5   :  { %v2177_v31 = vadd.f32 %v2167_v6, %v4017_v24  ;;  %2208 = vrot.lane.b32.xlu2 %v2200_v29, %s3014_s11  ;;  %v2225_v24 = vld [vmem:[%s4316_s13 + $0x8] sm:$0xff] }
 0xed6   :  { %2258 = vmatpush.msra.mxu3 %v2225_v24 }
 0xed7   :  { %v2188_v38 = vmul.f32 %v2185_v49, %v2177_v31 }
 0xed8   :  { %2259 = vmatpush.msra.mxu3 %v2224_v33 }
 0xed9   :  { %v2197_v51 = vadd.f32 %v2194_v52, %v2188_v38 }
 0xeda   :  { %2360 = vmatpush.msrb.mxu3 %v2328_v17 }
 0xedb   :  { %v2201_v12 = vmax.f32 %v2197_v51, 0.0 }
 0xedd   :  { %2210 = vrot.lane.b32.xlu0 %v2201_v12, %s3014_s11 }
 0xef4   :  { %v2169_v32 = vpop.permute.xlu0 %2168 }
 0xef5   :  { %v2178_v35 = vadd.f32 %v2169_v32, %v4021_v55 }
 0xef7   :  { %v2189_v62 = vmul.f32 %v2185_v49, %v2178_v35 }
 0xef9   :  { %v2198_v30 = vadd.f32 %v2194_v52, %v2189_v62 }
 0xefb   :  { %v2202_v22 = vmax.f32 %v2198_v30, 0.0 }
 0xefc   :  { %v2171_v36 = vpop.permute.xlu1 %2170 }
 0xefd   :  { %v2179_v57 = vadd.f32 %v2171_v36, %v4025_v9  ;;  %2212 = vrot.lane.b32.xlu1 %v2202_v22, %s3014_s11 }
 0xeff   :  { %v2190_v20 = vmul.f32 %v2185_v49, %v2179_v57 }
 0xf01   :  { %v2199_v0 = vadd.f32 %v2194_v52, %v2190_v20 }
 0xf03   :  { %v2203_v8 = vmax.f32 %v2199_v0, 0.0 }
 0xf05   :  { %2214 = vrot.lane.b32.xlu2 %v2203_v8, %s3014_s11 }
 0xf2f   :  { %v2209_v34 = vpop.permute.xlu2 %2208 }
 0xf30   :  { %v2220_v55 = vadd.f32 %v2209_v34, %v3998_v42  ;;  %v2278_v42 = vld [vmem:[%s4318_s15 + $0x8] sm:$0xff] }
 0xf31   :  { %2309 = vmatpush.msra.mxu2 %v2278_v42 }
 0xf32   :  { %2543 = vmatmul.msk.f32.vlgmr.msra.gmra.mxu3 %vm331_vm1, %v2220_v55 }
 0xf4f   :  { %v2211_v28 = vpop.permute.xlu0 %2210 }
 0xf50   :  { %v2221_v9 = vadd.f32 %v2211_v28, %v4003_v59  ;;  %v2277_v59 = vld [vmem:[%s4318_s15] sm:$0xff] }
 0xf51   :  { %2310 = vmatpush.msra.mxu2 %v2277_v59 }
 0xf52   :  { %2544 = vmatmul.msk.f32.gmra.mxu3 %vm331_vm1, %v2221_v9 }
 0xf5f   :  { %v2215_v23 = vpop.permute.xlu2 %2214 }
 0xf60   :  { %v2223_v3 = vadd.f32 %v2215_v23, %v4013_v1 }
 0xf6f   :  { %v2213_v44 = vpop.permute.xlu1 %2212 }
 0xf70   :  { %v2222_v15 = vadd.f32 %v2213_v44, %v4008_v53  ;;  %v2638_v53 = vld [vmem:[%s4317_s14] ss:$0 sm:$0xff] }
 0xf72   :  { %2545 = vmatmul.msk.f32.gmra.mxu3 %vm331_vm1, %v2222_v15 }
 0xf7a   :  { %2546 = vmatmul.msk.f32.gmra.mxu3 %vm331_vm1, %v2223_v3 }
 0xfb5   :  { %v2261_v45 = vpop.f32.mrf.mxu3 }
 0xfb6   :  { %v2262_v56 = vadd.f32 %v2638_v53, %v2261_v45 }
 0xfb8   :  { %v2273_v26 = vmax.f32 %v2262_v56, 0.0 }
 0xfba   :  { %2547 = vmatmul.msk.f32.vlgmr.msra.gmra.mxu2 %vm190_vm0, %v2273_v26 }
 0xfd5   :  { %v2264_v1 = vpop.f32.mrf.mxu3 }
 0xfd6   :  { %v2265_v39 = vadd.f32 %v2638_v53, %v2264_v1 }
 0xfd8   :  { %v2274_v47 = vmax.f32 %v2265_v39, 0.0 }
 0xfda   :  { %2548 = vmatmul.msk.f32.gmra.mxu2 %vm190_vm0, %v2274_v47 }
 0xff5   :  { %v2267_v46 = vpop.f32.mrf.mxu3 }
 0xff6   :  { %v2268_v41 = vadd.f32 %v2638_v53, %v2267_v46 }
 0xff8   :  { %v2275_v43 = vmax.f32 %v2268_v41, 0.0 }
 0xffa   :  { %2549 = vmatmul.msk.f32.gmra.mxu2 %vm190_vm0, %v2275_v43 }
 0xffd   :  { %v2270_v11 = vpop.f32.mrf.mxu3 }
 0xffe   :  { %v2271_v19 = vadd.f32 %v2638_v53, %v2270_v11 }
0x1000   :  { %v2276_v60 = vmax.f32 %v2271_v19, 0.0 }
0x1002   :  { %2550 = vmatmul.msk.f32.gmra.mxu2 %vm190_vm0, %v2276_v60 }
0x103d   :  { %v2312_v37 = vpop.f32.mrf.mxu2 }
0x103e   :  { %v2313_v10 = vadd.f32 %v2639_v48, %v2312_v37 }
0x1040   :  { %v2324_v40 = vmax.f32 %v2313_v10, 0.0 }
0x1042   :  { %2551 = vmatmul.msk.f32.vlgmr.msrb.gmra.mxu3 %vm245_vm2, %v2324_v40 }
0x105d   :  { %v2315_v14 = vpop.f32.mrf.mxu2 }
0x105e   :  { %v2316_v13 = vadd.f32 %v2639_v48, %v2315_v14 }
0x1060   :  { %v2325_v18 = vmax.f32 %v2316_v13, 0.0 }
0x1062   :  { %2552 = vmatmul.msk.f32.gmra.mxu3 %vm245_vm2, %v2325_v18 }
0x107d   :  { %v2318_v2 = vpop.f32.mrf.mxu2 }
0x107e   :  { %v2319_v58 = vadd.f32 %v2639_v48, %v2318_v2 }
0x1080   :  { %v2326_v16 = vmax.f32 %v2319_v58, 0.0 }
0x1082   :  { %2553 = vmatmul.msk.f32.gmra.mxu3 %vm245_vm2, %v2326_v16 }
0x1085   :  { %v2321_v50 = vpop.f32.mrf.mxu2 }
0x1086   :  { %v2322_v21 = vadd.f32 %v2639_v48, %v2321_v50 }
0x1088   :  { %v2327_v61 = vmax.f32 %v2322_v21, 0.0 }
0x108a   :  { %2554 = vmatmul.msk.f32.gmra.mxu3 %vm245_vm2, %v2327_v61 }
0x10c5   :  { %v2362_v5 = vpop.f32.mrf.mxu3 }
0x10c6   :  { %v2363_v49 = vadd.f32 %v2640_v7, %v2362_v5 }
0x10c8   :  { %2374 = vst [vmem:[#allocation16] sm:$0xff] %v2363_v49 }
0x10e5   :  { %v2365_v63 = vpop.f32.mrf.mxu3 }
0x10e6   :  { %v2366_v52 = vadd.f32 %v2640_v7, %v2365_v63 }
0x10e8   :  { %2375 = vst [vmem:[#allocation16 + $0x8] sm:$0xff] %v2366_v52 }
0x1105   :  { %v2368_v4 = vpop.f32.mrf.mxu3 }
0x1106   :  { %v2369_v25 = vadd.f32 %v2640_v7, %v2368_v4 }
0x1108   :  { %2376 = vst [vmem:[#allocation16 + $0x10] sm:$0xff] %v2369_v25 }
0x110d   :  { %v2371_v29 = vpop.f32.mrf.mxu3 }
0x110e   :  { %v2372_v6 = vadd.f32 %v2640_v7, %v2371_v29 }
0x1110   :  { %2377 = vst [vmem:[#allocation16 + $0x18] sm:$0xff] %v2372_v6 }
0x1111   :  { %2390 = dma.vmem_to_hbm [thread:$0]  %s2383_s8, 512, %s2385_s4, [#allocation4], %s3007_s2, %s3007_s2, %s3008_s24  }
0x1112   :  { %2999 = dma.done.wait [#allocation4], 512  }
0x1113   :  { %3000 = vsyncadd [#allocation4], 4294966784 }
0x1114   :  { %2395 = vsyncpa [#allocation3], 1 }
0x1115   :  { %2396 = vsyncpa [#allocation6], 1 }
0x1116   :  { %2397 = vsyncpa [#allocation9], 1 }
0x1117   :  { %2398 = vsyncpa [#allocation12], 1 }
0x1118   :  { %2399 = vsyncpa [#allocation15], 1 }
0x1119   :  { %2400 = vsyncpa [#allocation4], 1 }

</bundles_post_ra>
